<compile_context>
chip_gen: v6e
topology: v6e:2x2x1
jax: 0.10.0
libtpu: 0.0.40
codegen_flags: <defaults>
</compile_context>

<pallas_src>
import math
import functools

import jax
import jax.numpy as jnp
from jax.experimental import pallas as pl
from jax.experimental.pallas import tpu as pltpu


def _layer_norm(x, gamma, beta, eps=1e-5):
    mu = jnp.mean(x, axis=-1, keepdims=True)
    var = jnp.mean((x - mu) ** 2, axis=-1, keepdims=True)
    return (x - mu) * jax.lax.rsqrt(var + eps) * gamma + beta


def _vmem_limit_bytes():
    """Per-generation VMEM budget: ~100 MiB on 128-MiB parts (v5e/v6e), cap-16 MiB on v7x."""
    cap = None
    try:
        cap = getattr(pltpu.get_tpu_info(), "vmem_capacity_bytes", None)
    except Exception:
        cap = None
    if not cap:
        kind = ""
        try:
            kind = jax.devices()[0].device_kind.lower()
        except Exception:
            pass
        cap = (64 if "7" in kind else 128) * 1024 * 1024
    return int(max(32 * 1024 * 1024,
                   min(cap - 16 * 1024 * 1024, 100 * 1024 * 1024)))


def decoder_kernel(x_ref,
                   ln1_g_ref, ln1_b_ref,
                   wqkv_ref, bqkv_ref,
                   wo_ref, bo_ref,
                   ln2_g_ref, ln2_b_ref,
                   w1_ref, b1_ref, w2_ref, b2_ref,
                   out_ref, attnw_ref,
                   *, num_heads):
    """One (batch-element, layer) grid step.

    grid = (B, n_layers); the layer axis is 'arbitrary' so out_ref (block index depends only
    on b) is the VMEM-resident activation carried layer-to-layer, and every weight block
    (constant index, single-buffered) is DMA'd exactly once.
    """
    layer = pl.program_id(1)

    # Layer 0: pull the embedded+PE activations into the resident block.
    @pl.when(layer == 0)
    def _():
        out_ref[...] = x_ref[...]

    x = out_ref[0]                                   # (S, D) f32, resident across layers
    S, D = x.shape
    H = num_heads
    Dh = D // H
    bf16 = jnp.bfloat16

    # ---------------- norm1 (f32) ----------------
    h = _layer_norm(x, ln1_g_ref[...], ln1_b_ref[...])

    # ---------------- fused QKV projection (bf16 MXU, f32 accumulate) ----------------
    # wqkv columns are per-head interleaved: block h = [q_h | k_h | v_h] (3*Dh wide),
    # with 1/sqrt(Dh) pre-folded into the q columns / bias.
    qkv = (jnp.dot(h.astype(bf16), wqkv_ref[...],
                   preferred_element_type=jnp.float32) + bqkv_ref[...]).astype(bf16)

    # single H-way stack -> (H, S, 3*Dh): one bulk relayout instead of 3 stacks + H-way concat.
    st = jnp.stack([qkv[:, i * 3 * Dh:(i + 1) * 3 * Dh] for i in range(H)], axis=0)
    qh = st[:, :, 0:Dh]
    kh = st[:, :, Dh:2 * Dh]
    vh = st[:, :, 2 * Dh:3 * Dh]

    # ---------------- attention, batched over heads (leading batch dim) ----------------
    # TODO(synk): get_attn_mask(S, 'all') is assumed to mean "attend to all positions";
    # add an additive mask on `sc` if 'all' means otherwise.
    # TODO(synk): for long S, tile the kv axis (flash-style online softmax) instead of
    # materializing the full (H, S, S) scores.
    sc = jnp.einsum('hqd,hkd->hqk', qh, kh,
                    preferred_element_type=jnp.float32)                       # (H, S, S) f32
    m = jnp.max(sc, axis=-1, keepdims=True)
    # TODO(synk): on v6e/v7x the exp could run in bf16 on the EUP; kept f32 for v5e parity.
    e = jnp.exp(sc - m)
    denom = jnp.sum(e, axis=-1, keepdims=True)
    aw = (e * pl.reciprocal(denom, approx=True)).astype(attnw_ref.dtype)      # cast ONCE

    # single contiguous per-layer attention-map writeback (bf16 by default).
    # TODO(synk): average over heads here if the reference MHA returns head-averaged maps.
    attnw_ref[0] = aw

    ctx = jnp.einsum('hqk,hkd->hqd', aw.astype(bf16), vh,
                     preferred_element_type=jnp.float32).astype(bf16)         # (H, S, Dh)

    # head-blocked output projection: x2 = sum_h ctx_h @ Wo_h (no lane-concat of heads);
    # eval-mode "x = attn_dropout(x) + x" (== 2*attn_out) is pre-folded into wo/bo.
    x2 = jnp.einsum('hsd,hdo->hso', ctx, wo_ref[...],
                    preferred_element_type=jnp.float32)                       # (H, S, D)
    x2 = jnp.sum(x2, axis=0) + bo_ref[...]                                    # (S, D)

    # ---------------- norm2 + MLP (dropouts identity at eval) ----------------
    g = _layer_norm(x2, ln2_g_ref[...], ln2_b_ref[...])
    h1 = jnp.dot(g.astype(bf16), w1_ref[...],
                 preferred_element_type=jnp.float32) + b1_ref[...]            # (S, D*r)
    h1 = jnp.where(h1 > 0, h1, 0.01 * h1)            # LeakyReLU, default slope 0.01
    # eval-mode "x = mlp_dropout(x) + x" (== 2*mlp_out) folded into w2/b2 by the wrapper.
    x_new = jnp.dot(h1.astype(bf16), w2_ref[...],
                    preferred_element_type=jnp.float32) + b2_ref[...]         # (S, D)

    out_ref[0] = x_new                               # resident x for the next layer


def _prep_params(params, num_heads):
    """Build per-head-interleaved fused QKV, fold attention scale into Wq/bq, fold the
    eval-mode x2 doubling into Wo/bo and W2/b2, reshape Wo into head blocks, cast matmul
    weights to bf16 (accumulation stays f32 in-kernel)."""
    D = params['wq'].shape[0]
    H = num_heads
    Dh = D // H
    scale = 1.0 / math.sqrt(Dh)
    f32, bf16 = jnp.float32, jnp.bfloat16

    def head_cols(w):                 # (R, D) -> (R, H, Dh): head-major column blocks
        return w.reshape(w.shape[0], H, Dh)

    # per-head interleaved fused QKV: column block h is [q_h | k_h | v_h]
    wqkv = jnp.concatenate([head_cols(params['wq'] * scale),
                            head_cols(params['wk']),
                            head_cols(params['wv'])], axis=2).reshape(D, 3 * D).astype(bf16)
    bqkv = jnp.concatenate([head_cols(params['bq'] * scale),
                            head_cols(params['bk']),
                            head_cols(params['bv'])], axis=2).reshape(1, 3 * D).astype(f32)

    # head-blocked output projection rows; eval-mode 2x residual folded in
    wo_heads = (2.0 * params['wo']).reshape(H, Dh, D).astype(bf16)

    return (
        params['ln1_g'].astype(f32), params['ln1_b'].astype(f32),
        wqkv, bqkv,
        wo_heads, (2.0 * params['bo']).astype(f32),
        params['ln2_g'].astype(f32), params['ln2_b'].astype(f32),
        params['w1'].astype(bf16), params['b1'].astype(f32),
        (2.0 * params['w2']).astype(bf16), (2.0 * params['b2']).astype(f32),
    )


def transformer_decoder_forward(token_ids, embed_table, pe_table, params, *,
                                n_layers, num_heads,
                                attn_weights_dtype=jnp.bfloat16,
                                single_buffer_weights=True):
    B, S = token_ids.shape
    D = embed_table.shape[1]
    H = num_heads
    Dh = D // H
    Dr = params['w1'].shape[1]

    # EmbeddingWithPE: token lookup + additive sinusoidal PE (gather stays in XLA glue).
    x = (jnp.take(embed_table, token_ids, axis=0)
         + pe_table[:S][None, :, :]).astype(jnp.float32)                      # (B, S, D)

    # TODO(synk): pad S/D/Dr to multiples of (8, 128) here at production sizes; sub-128 lane
    # dims lower to masked vector ops inside the kernel.
    # TODO(synk): when S < 256, block several batch elements per grid step (M = Bt*S) to
    # raise MXU utilization on v6e/v7x (small-S demo configs are overhead-bound anyway).
    prep = _prep_params(params, num_heads)
    kernel = functools.partial(decoder_kernel, num_heads=num_heads)

    def const_spec(shape):            # whole-array weight, constant block index
        idx = lambda b, l: (0,) * len(shape)
        if single_buffer_weights:     # never re-fetched -> double buffering is wasted VMEM
            return pl.BlockSpec(shape, idx, pipeline_mode=pl.Buffered(1))
        return pl.BlockSpec(shape, idx)

    x_out, attnw = pl.pallas_call(
        kernel,
        grid=(B, n_layers),
        in_specs=[
            pl.BlockSpec((1, S, D), lambda b, l: (b, 0, 0)),                  # embedded x
            const_spec((1, D)), const_spec((1, D)),                           # ln1 g/b
            const_spec((D, 3 * D)), const_spec((1, 3 * D)),                   # fused QKV (interleaved)
            const_spec((H, Dh, D)), const_spec((1, D)),                       # 2*wo (head-blocked), 2*bo
            const_spec((1, D)), const_spec((1, D)),                           # ln2 g/b
            const_spec((D, Dr)), const_spec((1, Dr)),                         # w1, b1
            const_spec((Dr, D)), const_spec((1, D)),                          # 2*w2, 2*b2
        ],
        out_specs=(
            pl.BlockSpec((1, S, D), lambda b, l: (b, 0, 0)),                  # resident x
            # one contiguous block per (b, l); inner (layer) steps write adjacent HBM.
            pl.BlockSpec((1, H, S, S), lambda b, l: (b * n_layers + l, 0, 0, 0)),
        ),
        out_shape=(jax.ShapeDtypeStruct((B, S, D), jnp.float32),
                   jax.ShapeDtypeStruct((B * n_layers, H, S, S), attn_weights_dtype)),
        compiler_params=pltpu.CompilerParams(
            dimension_semantics=("parallel", "arbitrary"),
            vmem_limit_bytes=_vmem_limit_bytes()),
    )(x, *prep)

    attnw = attnw.reshape(B, n_layers, H, S, S)
    # list of per-layer attention maps, mirroring the module's attn_weights list.
    return x_out, [attnw[:, l] for l in range(n_layers)]


def sinusoidal_pe(max_len, d):
    pos = jnp.arange(max_len, dtype=jnp.float32)[:, None]
    i = jnp.arange(0, d, 2, dtype=jnp.float32)
    div = jnp.exp(-i * (math.log(10000.0) / d))
    pe = jnp.zeros((max_len, d), jnp.float32)
    pe = pe.at[:, 0::2].set(jnp.sin(pos * div))
    pe = pe.at[:, 1::2].set(jnp.cos(pos * div))
    return pe


if __name__ == "__main__":
    # small, module-consistent shapes
    B, S = 2, 8
    n_layers = 2
    vocab_size, embed_dim, num_heads, max_len, r = 50, 32, 4, 16, 2
    D, Dr = embed_dim, embed_dim * r

    key = jax.random.PRNGKey(0)
    keys = jax.random.split(key, 16)

    def nrm(k, shape, scale=0.02):
        return (scale * jax.random.normal(k, shape)).astype(jnp.float32)

    params = {
        'ln1_g': jnp.ones((1, D), jnp.float32), 'ln1_b': jnp.zeros((1, D), jnp.float32),
        'ln2_g': jnp.ones((1, D), jnp.float32), 'ln2_b': jnp.zeros((1, D), jnp.float32),
        'wq': nrm(keys[0], (D, D)),  'bq': nrm(keys[1], (1, D)),
        'wk': nrm(keys[2], (D, D)),  'bk': nrm(keys[3], (1, D)),
        'wv': nrm(keys[4], (D, D)),  'bv': nrm(keys[5], (1, D)),
        'wo': nrm(keys[6], (D, D)),  'bo': nrm(keys[7], (1, D)),
        'w1': nrm(keys[8], (D, Dr)), 'b1': nrm(keys[9], (1, Dr)),
        'w2': nrm(keys[10], (Dr, D)), 'b2': nrm(keys[11], (1, D)),
    }
    embed_table = nrm(keys[12], (vocab_size, D), scale=1.0)
    pe_table = sinusoidal_pe(max_len, D)
    token_ids = jax.random.randint(keys[13], (B, S), 0, vocab_size, dtype=jnp.int32)

    def run(single_buffer_weights):
        fwd = jax.jit(functools.partial(
            transformer_decoder_forward, n_layers=n_layers, num_heads=num_heads,
            single_buffer_weights=single_buffer_weights))
        x_out, attn_weights = fwd(token_ids, embed_table, pe_table, params)
        jax.block_until_ready(x_out)
        for aw in attn_weights:
            jax.block_until_ready(aw)
        return x_out, attn_weights

    try:
        x_out, attn_weights = run(True)
    except Exception:
        # TODO(synk): this jax build rejects pipeline_mode=pl.Buffered(1) on pallas_call
        # BlockSpecs; fall back to default (double-buffered) weight blocks.
        x_out, attn_weights = run(False)

    assert x_out.shape == (B, S, D)
    assert len(attn_weights) == n_layers
    assert all(a.shape == (B, num_heads, S, S) for a in attn_weights)
    print("KERNEL_OK")
</pallas_src>

<mosaic_0001>
module attributes {stable_mosaic.version = 11 : i64} {
  func.func @decoder_kernel(%arg0: i32, %arg1: i32, %arg2: memref<1x8x32xf32, #tpu.memory_space<vmem>>, %arg3: memref<1x32xf32, #tpu.memory_space<vmem>>, %arg4: memref<1x32xf32, #tpu.memory_space<vmem>>, %arg5: memref<32x96xbf16, #tpu.memory_space<vmem>>, %arg6: memref<1x96xf32, #tpu.memory_space<vmem>>, %arg7: memref<4x8x32xbf16, #tpu.memory_space<vmem>>, %arg8: memref<1x32xf32, #tpu.memory_space<vmem>>, %arg9: memref<1x32xf32, #tpu.memory_space<vmem>>, %arg10: memref<1x32xf32, #tpu.memory_space<vmem>>, %arg11: memref<32x64xbf16, #tpu.memory_space<vmem>>, %arg12: memref<1x64xf32, #tpu.memory_space<vmem>>, %arg13: memref<64x32xbf16, #tpu.memory_space<vmem>>, %arg14: memref<1x32xf32, #tpu.memory_space<vmem>>, %arg15: memref<1x8x32xf32, #tpu.memory_space<vmem>>, %arg16: memref<1x4x8x8xbf16, #tpu.memory_space<vmem>>) attributes {dimension_semantics = [#tpu.dimension_semantics<parallel>, #tpu.dimension_semantics<arbitrary>], iteration_bounds = array<i64: 2, 2>, scalar_prefetch = 0 : i64, scratch_operands = 0 : i64, tpu.core_type = #tpu.core_type<tc>, window_params = [{transform_indices = @transform_0, window_bounds = array<i64: 1, 8, 32>}, {pipeline_mode = #tpu.pipeline_mode<synchronous>, transform_indices = @transform_1, window_bounds = array<i64: 1, 32>}, {pipeline_mode = #tpu.pipeline_mode<synchronous>, transform_indices = @transform_2, window_bounds = array<i64: 1, 32>}, {pipeline_mode = #tpu.pipeline_mode<synchronous>, transform_indices = @transform_3, window_bounds = array<i64: 32, 96>}, {pipeline_mode = #tpu.pipeline_mode<synchronous>, transform_indices = @transform_4, window_bounds = array<i64: 1, 96>}, {pipeline_mode = #tpu.pipeline_mode<synchronous>, transform_indices = @transform_5, window_bounds = array<i64: 4, 8, 32>}, {pipeline_mode = #tpu.pipeline_mode<synchronous>, transform_indices = @transform_6, window_bounds = array<i64: 1, 32>}, {pipeline_mode = #tpu.pipeline_mode<synchronous>, transform_indices = @transform_7, window_bounds = array<i64: 1, 32>}, {pipeline_mode = #tpu.pipeline_mode<synchronous>, transform_indices = @transform_8, window_bounds = array<i64: 1, 32>}, {pipeline_mode = #tpu.pipeline_mode<synchronous>, transform_indices = @transform_9, window_bounds = array<i64: 32, 64>}, {pipeline_mode = #tpu.pipeline_mode<synchronous>, transform_indices = @transform_10, window_bounds = array<i64: 1, 64>}, {pipeline_mode = #tpu.pipeline_mode<synchronous>, transform_indices = @transform_11, window_bounds = array<i64: 64, 32>}, {pipeline_mode = #tpu.pipeline_mode<synchronous>, transform_indices = @transform_12, window_bounds = array<i64: 1, 32>}, {transform_indices = @transform_13, window_bounds = array<i64: 1, 8, 32>}, {transform_indices = @transform_14, window_bounds = array<i64: 1, 4, 8, 8>}]} {
    %c0_i32 = arith.constant 0 : i32
    %0 = arith.cmpi eq, %arg1, %c0_i32 : i32
    %1 = arith.extui %0 : i1 to i32
    %c0_i32_0 = arith.constant 0 : i32
    %2 = arith.cmpi ne, %1, %c0_i32_0 : i32
    scf.if %2 {
      %c0_55 = arith.constant 0 : index
      %c0_56 = arith.constant 0 : index
      %c0_57 = arith.constant 0 : index
      %115 = vector.load %arg2[%c0_55, %c0_56, %c0_57] : memref<1x8x32xf32, #tpu.memory_space<vmem>>, vector<1x8x32xf32>
      %c0_58 = arith.constant 0 : index
      %c0_59 = arith.constant 0 : index
      %c0_60 = arith.constant 0 : index
      %116 = vector.load %arg15[%c0_58, %c0_59, %c0_60] : memref<1x8x32xf32, #tpu.memory_space<vmem>>, vector<1x8x32xf32>
      tpu.vector_store %arg15[%c0_58, %c0_59, %c0_60], %115 {strides = array<i32>} : memref<1x8x32xf32, #tpu.memory_space<vmem>>, vector<1x8x32xf32>,
    } else {
    }
    %c0 = arith.constant 0 : index
    %c0_1 = arith.constant 0 : index
    %c0_2 = arith.constant 0 : index
    %3 = vector.load %arg15[%c0, %c0_1, %c0_2] : memref<1x8x32xf32, #tpu.memory_space<vmem>>, vector<1x8x32xf32>
    %4 = vector.shape_cast %3 : vector<1x8x32xf32> to vector<8x32xf32>
    %c0_3 = arith.constant 0 : index
    %c0_4 = arith.constant 0 : index
    %5 = vector.load %arg3[%c0_3, %c0_4] : memref<1x32xf32, #tpu.memory_space<vmem>>, vector<1x32xf32>
    %c0_5 = arith.constant 0 : index
    %c0_6 = arith.constant 0 : index
    %6 = vector.load %arg4[%c0_5, %c0_6] : memref<1x32xf32, #tpu.memory_space<vmem>>, vector<1x32xf32>
    %cst = arith.constant dense<0.000000e+00> : vector<8xf32>
    %7 = vector.multi_reduction <add>, %4, %cst [1] : vector<8x32xf32> to vector<8xf32>
    %8 = vector.shape_cast %7 : vector<8xf32> to vector<8x1xf32>
    %cst_7 = arith.constant 3.200000e+01 : f32
    %9 = vector.broadcast %cst_7 : f32 to vector<8x1xf32>
    %10 = arith.divf %8, %9 : vector<8x1xf32>
    %11 = vector.broadcast %10 : vector<8x1xf32> to vector<8x32xf32>
    %12 = arith.subf %4, %11 : vector<8x32xf32>
    %13 = arith.mulf %12, %12 : vector<8x32xf32>
    %cst_8 = arith.constant dense<0.000000e+00> : vector<8xf32>
    %14 = vector.multi_reduction <add>, %13, %cst_8 [1] : vector<8x32xf32> to vector<8xf32>
    %15 = vector.shape_cast %14 : vector<8xf32> to vector<8x1xf32>
    %cst_9 = arith.constant 3.200000e+01 : f32
    %16 = vector.broadcast %cst_9 : f32 to vector<8x1xf32>
    %17 = arith.divf %15, %16 : vector<8x1xf32>
    %18 = vector.broadcast %10 : vector<8x1xf32> to vector<8x32xf32>
    %19 = arith.subf %4, %18 : vector<8x32xf32>
    %cst_10 = arith.constant 9.99999974E-6 : f32
    %20 = vector.broadcast %cst_10 : f32 to vector<8x1xf32>
    %21 = arith.addf %17, %20 : vector<8x1xf32>
    %22 = math.rsqrt %21 : vector<8x1xf32>
    %23 = vector.broadcast %22 : vector<8x1xf32> to vector<8x32xf32>
    %24 = arith.mulf %19, %23 : vector<8x32xf32>
    %25 = vector.broadcast %5 : vector<1x32xf32> to vector<8x32xf32>
    %26 = arith.mulf %24, %25 : vector<8x32xf32>
    %27 = vector.broadcast %6 : vector<1x32xf32> to vector<8x32xf32>
    %28 = arith.addf %26, %27 : vector<8x32xf32>
    %29 = arith.truncf %28 : vector<8x32xf32> to vector<8x32xbf16>
    %c0_11 = arith.constant 0 : index
    %c0_12 = arith.constant 0 : index
    %30 = vector.load %arg5[%c0_11, %c0_12] : memref<32x96xbf16, #tpu.memory_space<vmem>>, vector<32x96xbf16>
    %cst_13 = arith.constant dense<0.000000e+00> : vector<8x96xf32>
    %31 = tpu.matmul %29, %30, %cst_13 {dimension_numbers = #tpu.dot_dimension_numbers<[1], [0], [0], [1], [0, 0, 1, 1], [], []>} : vector<8x32xbf16>, vector<32x96xbf16>, vector<8x96xf32> -> vector<8x96xf32>
    %c0_14 = arith.constant 0 : index
    %c0_15 = arith.constant 0 : index
    %32 = vector.load %arg6[%c0_14, %c0_15] : memref<1x96xf32, #tpu.memory_space<vmem>>, vector<1x96xf32>
    %33 = vector.broadcast %32 : vector<1x96xf32> to vector<8x96xf32>
    %34 = arith.addf %31, %33 : vector<8x96xf32>
    %35 = arith.truncf %34 : vector<8x96xf32> to vector<8x96xbf16>
    %36 = vector.extract_strided_slice %35 {offsets = [0, 0], sizes = [8, 24], strides = [1, 1]} : vector<8x96xbf16> to vector<8x24xbf16>
    %37 = vector.extract_strided_slice %35 {offsets = [0, 24], sizes = [8, 24], strides = [1, 1]} : vector<8x96xbf16> to vector<8x24xbf16>
    %38 = vector.extract_strided_slice %35 {offsets = [0, 48], sizes = [8, 24], strides = [1, 1]} : vector<8x96xbf16> to vector<8x24xbf16>
    %39 = vector.extract_strided_slice %35 {offsets = [0, 72], sizes = [8, 24], strides = [1, 1]} : vector<8x96xbf16> to vector<8x24xbf16>
    %40 = vector.shape_cast %36 : vector<8x24xbf16> to vector<1x8x24xbf16>
    %41 = vector.shape_cast %37 : vector<8x24xbf16> to vector<1x8x24xbf16>
    %42 = vector.shape_cast %38 : vector<8x24xbf16> to vector<1x8x24xbf16>
    %43 = vector.shape_cast %39 : vector<8x24xbf16> to vector<1x8x24xbf16>
    %44 = tpu.concatenate %40, %41, %42, %43 in 0 : vector<1x8x24xbf16>, vector<1x8x24xbf16>, vector<1x8x24xbf16>, vector<1x8x24xbf16> -> vector<4x8x24xbf16>
    %45 = vector.extract_strided_slice %44 {offsets = [0, 0, 0], sizes = [4, 8, 8], strides = [1, 1, 1]} : vector<4x8x24xbf16> to vector<4x8x8xbf16>
    %46 = vector.extract_strided_slice %44 {offsets = [0, 0, 8], sizes = [4, 8, 8], strides = [1, 1, 1]} : vector<4x8x24xbf16> to vector<4x8x8xbf16>
    %47 = vector.extract_strided_slice %44 {offsets = [0, 0, 16], sizes = [4, 8, 8], strides = [1, 1, 1]} : vector<4x8x24xbf16> to vector<4x8x8xbf16>
    "tpu.trace_start"() <{level = 10 : i32, message = "hqd,hkd->hqk"}> : () -> ()
    %cst_16 = arith.constant dense<0.000000e+00> : vector<4x8x8xf32>
    %48 = tpu.matmul %45, %46, %cst_16 {dimension_numbers = #tpu.dot_dimension_numbers<[2], [2], [1], [1], [0, 0, 0, 1, 1, 1], [0], [0]>} : vector<4x8x8xbf16>, vector<4x8x8xbf16>, vector<4x8x8xf32> -> vector<4x8x8xf32>
    "tpu.trace_stop"() : () -> ()
    %cst_17 = arith.constant dense<0xFF800000> : vector<4x8xf32>
    %49 = vector.multi_reduction <maximumf>, %48, %cst_17 [2] : vector<4x8x8xf32> to vector<4x8xf32>
    %50 = vector.shape_cast %49 : vector<4x8xf32> to vector<4x8x1xf32>
    %51 = vector.broadcast %50 : vector<4x8x1xf32> to vector<4x8x8xf32>
    %52 = arith.subf %48, %51 : vector<4x8x8xf32>
    %53 = math.exp %52 : vector<4x8x8xf32>
    %cst_18 = arith.constant dense<0.000000e+00> : vector<4x8xf32>
    %54 = vector.multi_reduction <add>, %53, %cst_18 [2] : vector<4x8x8xf32> to vector<4x8xf32>
    %55 = vector.shape_cast %54 : vector<4x8xf32> to vector<4x8x1xf32>
    %56 = tpu.reciprocal %55 {approx = true} : vector<4x8x1xf32> -> vector<4x8x1xf32>
    %57 = vector.broadcast %56 : vector<4x8x1xf32> to vector<4x8x8xf32>
    %58 = arith.mulf %53, %57 : vector<4x8x8xf32>
    %59 = arith.truncf %58 : vector<4x8x8xf32> to vector<4x8x8xbf16>
    %c0_19 = arith.constant 0 : index
    %c0_20 = arith.constant 0 : index
    %c0_21 = arith.constant 0 : index
    %c0_22 = arith.constant 0 : index
    %60 = vector.load %arg16[%c0_19, %c0_20, %c0_21, %c0_22] : memref<1x4x8x8xbf16, #tpu.memory_space<vmem>>, vector<1x4x8x8xbf16>
    %61 = vector.shape_cast %60 : vector<1x4x8x8xbf16> to vector<4x8x8xbf16>
    %62 = vector.shape_cast %59 : vector<4x8x8xbf16> to vector<1x4x8x8xbf16>
    tpu.vector_store %arg16[%c0_19, %c0_20, %c0_21, %c0_22], %62 {strides = array<i32>} : memref<1x4x8x8xbf16, #tpu.memory_space<vmem>>, vector<1x4x8x8xbf16>,
    "tpu.trace_start"() <{level = 10 : i32, message = "hqk,hkd->hqd"}> : () -> ()
    %cst_23 = arith.constant dense<0.000000e+00> : vector<4x8x8xf32>
    %63 = tpu.matmul %59, %47, %cst_23 {dimension_numbers = #tpu.dot_dimension_numbers<[2], [1], [1], [2], [0, 0, 0, 1, 1, 2], [0], [0]>} : vector<4x8x8xbf16>, vector<4x8x8xbf16>, vector<4x8x8xf32> -> vector<4x8x8xf32>
    "tpu.trace_stop"() : () -> ()
    %64 = arith.truncf %63 : vector<4x8x8xf32> to vector<4x8x8xbf16>
    %c0_24 = arith.constant 0 : index
    %c0_25 = arith.constant 0 : index
    %c0_26 = arith.constant 0 : index
    %65 = vector.load %arg7[%c0_24, %c0_25, %c0_26] : memref<4x8x32xbf16, #tpu.memory_space<vmem>>, vector<4x8x32xbf16>
    "tpu.trace_start"() <{level = 10 : i32, message = "hsd,hdo->hso"}> : () -> ()
    %cst_27 = arith.constant dense<0.000000e+00> : vector<4x8x32xf32>
    %66 = tpu.matmul %64, %65, %cst_27 {dimension_numbers = #tpu.dot_dimension_numbers<[2], [1], [1], [2], [0, 0, 0, 1, 1, 2], [0], [0]>} : vector<4x8x8xbf16>, vector<4x8x32xbf16>, vector<4x8x32xf32> -> vector<4x8x32xf32>
    "tpu.trace_stop"() : () -> ()
    %cst_28 = arith.constant dense<0.000000e+00> : vector<8x32xf32>
    %67 = vector.multi_reduction <add>, %66, %cst_28 [0] : vector<4x8x32xf32> to vector<8x32xf32>
    %c0_29 = arith.constant 0 : index
    %c0_30 = arith.constant 0 : index
    %68 = vector.load %arg8[%c0_29, %c0_30] : memref<1x32xf32, #tpu.memory_space<vmem>>, vector<1x32xf32>
    %69 = vector.broadcast %68 : vector<1x32xf32> to vector<8x32xf32>
    %70 = arith.addf %67, %69 : vector<8x32xf32>
    %c0_31 = arith.constant 0 : index
    %c0_32 = arith.constant 0 : index
    %71 = vector.load %arg9[%c0_31, %c0_32] : memref<1x32xf32, #tpu.memory_space<vmem>>, vector<1x32xf32>
    %c0_33 = arith.constant 0 : index
    %c0_34 = arith.constant 0 : index
    %72 = vector.load %arg10[%c0_33, %c0_34] : memref<1x32xf32, #tpu.memory_space<vmem>>, vector<1x32xf32>
    %cst_35 = arith.constant dense<0.000000e+00> : vector<8xf32>
    %73 = vector.multi_reduction <add>, %70, %cst_35 [1] : vector<8x32xf32> to vector<8xf32>
    %74 = vector.shape_cast %73 : vector<8xf32> to vector<8x1xf32>
    %cst_36 = arith.constant 3.200000e+01 : f32
    %75 = vector.broadcast %cst_36 : f32 to vector<8x1xf32>
    %76 = arith.divf %74, %75 : vector<8x1xf32>
    %77 = vector.broadcast %76 : vector<8x1xf32> to vector<8x32xf32>
    %78 = arith.subf %70, %77 : vector<8x32xf32>
    %79 = arith.mulf %78, %78 : vector<8x32xf32>
    %cst_37 = arith.constant dense<0.000000e+00> : vector<8xf32>
    %80 = vector.multi_reduction <add>, %79, %cst_37 [1] : vector<8x32xf32> to vector<8xf32>
    %81 = vector.shape_cast %80 : vector<8xf32> to vector<8x1xf32>
    %cst_38 = arith.constant 3.200000e+01 : f32
    %82 = vector.broadcast %cst_38 : f32 to vector<8x1xf32>
    %83 = arith.divf %81, %82 : vector<8x1xf32>
    %84 = vector.broadcast %76 : vector<8x1xf32> to vector<8x32xf32>
    %85 = arith.subf %70, %84 : vector<8x32xf32>
    %cst_39 = arith.constant 9.99999974E-6 : f32
    %86 = vector.broadcast %cst_39 : f32 to vector<8x1xf32>
    %87 = arith.addf %83, %86 : vector<8x1xf32>
    %88 = math.rsqrt %87 : vector<8x1xf32>
    %89 = vector.broadcast %88 : vector<8x1xf32> to vector<8x32xf32>
    %90 = arith.mulf %85, %89 : vector<8x32xf32>
    %91 = vector.broadcast %71 : vector<1x32xf32> to vector<8x32xf32>
    %92 = arith.mulf %90, %91 : vector<8x32xf32>
    %93 = vector.broadcast %72 : vector<1x32xf32> to vector<8x32xf32>
    %94 = arith.addf %92, %93 : vector<8x32xf32>
    %95 = arith.truncf %94 : vector<8x32xf32> to vector<8x32xbf16>
    %c0_40 = arith.constant 0 : index
    %c0_41 = arith.constant 0 : index
    %96 = vector.load %arg11[%c0_40, %c0_41] : memref<32x64xbf16, #tpu.memory_space<vmem>>, vector<32x64xbf16>
    %cst_42 = arith.constant dense<0.000000e+00> : vector<8x64xf32>
    %97 = tpu.matmul %95, %96, %cst_42 {dimension_numbers = #tpu.dot_dimension_numbers<[1], [0], [0], [1], [0, 0, 1, 1], [], []>} : vector<8x32xbf16>, vector<32x64xbf16>, vector<8x64xf32> -> vector<8x64xf32>
    %c0_43 = arith.constant 0 : index
    %c0_44 = arith.constant 0 : index
    %98 = vector.load %arg12[%c0_43, %c0_44] : memref<1x64xf32, #tpu.memory_space<vmem>>, vector<1x64xf32>
    %99 = vector.broadcast %98 : vector<1x64xf32> to vector<8x64xf32>
    %100 = arith.addf %97, %99 : vector<8x64xf32>
    %cst_45 = arith.constant 0.000000e+00 : f32
    %101 = vector.broadcast %cst_45 : f32 to vector<8x64xf32>
    %102 = arith.cmpf ogt, %100, %101 : vector<8x64xf32>
    %cst_46 = arith.constant 0.00999999977 : f32
    %103 = vector.broadcast %cst_46 : f32 to vector<8x64xf32>
    %104 = arith.mulf %103, %100 : vector<8x64xf32>
    %105 = arith.select %102, %100, %104 : vector<8x64xi1>, vector<8x64xf32>
    %106 = arith.truncf %105 : vector<8x64xf32> to vector<8x64xbf16>
    %c0_47 = arith.constant 0 : index
    %c0_48 = arith.constant 0 : index
    %107 = vector.load %arg13[%c0_47, %c0_48] : memref<64x32xbf16, #tpu.memory_space<vmem>>, vector<64x32xbf16>
    %cst_49 = arith.constant dense<0.000000e+00> : vector<8x32xf32>
    %108 = tpu.matmul %106, %107, %cst_49 {dimension_numbers = #tpu.dot_dimension_numbers<[1], [0], [0], [1], [0, 0, 1, 1], [], []>} : vector<8x64xbf16>, vector<64x32xbf16>, vector<8x32xf32> -> vector<8x32xf32>
    %c0_50 = arith.constant 0 : index
    %c0_51 = arith.constant 0 : index
    %109 = vector.load %arg14[%c0_50, %c0_51] : memref<1x32xf32, #tpu.memory_space<vmem>>, vector<1x32xf32>
    %110 = vector.broadcast %109 : vector<1x32xf32> to vector<8x32xf32>
    %111 = arith.addf %108, %110 : vector<8x32xf32>
    %c0_52 = arith.constant 0 : index
    %c0_53 = arith.constant 0 : index
    %c0_54 = arith.constant 0 : index
    %112 = vector.load %arg15[%c0_52, %c0_53, %c0_54] : memref<1x8x32xf32, #tpu.memory_space<vmem>>, vector<1x8x32xf32>
    %113 = vector.shape_cast %112 : vector<1x8x32xf32> to vector<8x32xf32>
    %114 = vector.shape_cast %111 : vector<8x32xf32> to vector<1x8x32xf32>
    tpu.vector_store %arg15[%c0_52, %c0_53, %c0_54], %114 {strides = array<i32>} : memref<1x8x32xf32, #tpu.memory_space<vmem>>, vector<1x8x32xf32>,
    return
  }
  func.func @transform_0(%arg0: i32, %arg1: i32) -> (i32, i32, i32) {
    %c0_i32 = arith.constant 0 : i32
    %c0_i32_0 = arith.constant 0 : i32
    %c0_i32_1 = arith.constant 0 : i32
    return %arg0, %c0_i32, %c0_i32_0 : i32, i32, i32
  }
  func.func @transform_1(%arg0: i32, %arg1: i32) -> (i32, i32) {
    %c0_i32 = arith.constant 0 : i32
    %c0_i32_0 = arith.constant 0 : i32
    %c0_i32_1 = arith.constant 0 : i32
    return %c0_i32, %c0_i32_0 : i32, i32
  }
  func.func @transform_2(%arg0: i32, %arg1: i32) -> (i32, i32) {
    %c0_i32 = arith.constant 0 : i32
    %c0_i32_0 = arith.constant 0 : i32
    %c0_i32_1 = arith.constant 0 : i32
    return %c0_i32, %c0_i32_0 : i32, i32
  }
  func.func @transform_3(%arg0: i32, %arg1: i32) -> (i32, i32) {
    %c0_i32 = arith.constant 0 : i32
    %c0_i32_0 = arith.constant 0 : i32
    %c0_i32_1 = arith.constant 0 : i32
    return %c0_i32, %c0_i32_0 : i32, i32
  }
  func.func @transform_4(%arg0: i32, %arg1: i32) -> (i32, i32) {
    %c0_i32 = arith.constant 0 : i32
    %c0_i32_0 = arith.constant 0 : i32
    %c0_i32_1 = arith.constant 0 : i32
    return %c0_i32, %c0_i32_0 : i32, i32
  }
  func.func @transform_5(%arg0: i32, %arg1: i32) -> (i32, i32, i32) {
    %c0_i32 = arith.constant 0 : i32
    %c0_i32_0 = arith.constant 0 : i32
    %c0_i32_1 = arith.constant 0 : i32
    %c0_i32_2 = arith.constant 0 : i32
    return %c0_i32, %c0_i32_0, %c0_i32_1 : i32, i32, i32
  }
  func.func @transform_6(%arg0: i32, %arg1: i32) -> (i32, i32) {
    %c0_i32 = arith.constant 0 : i32
    %c0_i32_0 = arith.constant 0 : i32
    %c0_i32_1 = arith.constant 0 : i32
    return %c0_i32, %c0_i32_0 : i32, i32
  }
  func.func @transform_7(%arg0: i32, %arg1: i32) -> (i32, i32) {
    %c0_i32 = arith.constant 0 : i32
    %c0_i32_0 = arith.constant 0 : i32
    %c0_i32_1 = arith.constant 0 : i32
    return %c0_i32, %c0_i32_0 : i32, i32
  }
  func.func @transform_8(%arg0: i32, %arg1: i32) -> (i32, i32) {
    %c0_i32 = arith.constant 0 : i32
    %c0_i32_0 = arith.constant 0 : i32
    %c0_i32_1 = arith.constant 0 : i32
    return %c0_i32, %c0_i32_0 : i32, i32
  }
  func.func @transform_9(%arg0: i32, %arg1: i32) -> (i32, i32) {
    %c0_i32 = arith.constant 0 : i32
    %c0_i32_0 = arith.constant 0 : i32
    %c0_i32_1 = arith.constant 0 : i32
    return %c0_i32, %c0_i32_0 : i32, i32
  }
  func.func @transform_10(%arg0: i32, %arg1: i32) -> (i32, i32) {
    %c0_i32 = arith.constant 0 : i32
    %c0_i32_0 = arith.constant 0 : i32
    %c0_i32_1 = arith.constant 0 : i32
    return %c0_i32, %c0_i32_0 : i32, i32
  }
  func.func @transform_11(%arg0: i32, %arg1: i32) -> (i32, i32) {
    %c0_i32 = arith.constant 0 : i32
    %c0_i32_0 = arith.constant 0 : i32
    %c0_i32_1 = arith.constant 0 : i32
    return %c0_i32, %c0_i32_0 : i32, i32
  }
  func.func @transform_12(%arg0: i32, %arg1: i32) -> (i32, i32) {
    %c0_i32 = arith.constant 0 : i32
    %c0_i32_0 = arith.constant 0 : i32
    %c0_i32_1 = arith.constant 0 : i32
    return %c0_i32, %c0_i32_0 : i32, i32
  }
  func.func @transform_13(%arg0: i32, %arg1: i32) -> (i32, i32, i32) {
    %c0_i32 = arith.constant 0 : i32
    %c0_i32_0 = arith.constant 0 : i32
    %c0_i32_1 = arith.constant 0 : i32
    return %arg0, %c0_i32, %c0_i32_0 : i32, i32, i32
  }
  func.func @transform_14(%arg0: i32, %arg1: i32) -> (i32, i32, i32, i32) {
    %c2_i32 = arith.constant 2 : i32
    %0 = arith.muli %arg0, %c2_i32 : i32
    %1 = arith.addi %0, %arg1 : i32
    %c0_i32 = arith.constant 0 : i32
    %c0_i32_0 = arith.constant 0 : i32
    %c0_i32_1 = arith.constant 0 : i32
    %c0_i32_2 = arith.constant 0 : i32
    return %1, %c0_i32, %c0_i32_0, %c0_i32_1 : i32, i32, i32, i32
  }
}

module attributes {stable_mosaic.version = 11 : i64} {
  func.func @decoder_kernel(%arg0: i32, %arg1: i32, %arg2: memref<1x8x32xf32, #tpu.memory_space<vmem>>, %arg3: memref<1x32xf32, #tpu.memory_space<vmem>>, %arg4: memref<1x32xf32, #tpu.memory_space<vmem>>, %arg5: memref<32x96xbf16, #tpu.memory_space<vmem>>, %arg6: memref<1x96xf32, #tpu.memory_space<vmem>>, %arg7: memref<4x8x32xbf16, #tpu.memory_space<vmem>>, %arg8: memref<1x32xf32, #tpu.memory_space<vmem>>, %arg9: memref<1x32xf32, #tpu.memory_space<vmem>>, %arg10: memref<1x32xf32, #tpu.memory_space<vmem>>, %arg11: memref<32x64xbf16, #tpu.memory_space<vmem>>, %arg12: memref<1x64xf32, #tpu.memory_space<vmem>>, %arg13: memref<64x32xbf16, #tpu.memory_space<vmem>>, %arg14: memref<1x32xf32, #tpu.memory_space<vmem>>, %arg15: memref<1x8x32xf32, #tpu.memory_space<vmem>>, %arg16: memref<1x4x8x8xbf16, #tpu.memory_space<vmem>>) attributes {dimension_semantics = [#tpu.dimension_semantics<parallel>, #tpu.dimension_semantics<arbitrary>], iteration_bounds = array<i64: 2, 2>, scalar_prefetch = 0 : i64, scratch_operands = 0 : i64, tpu.core_type = #tpu.core_type<tc>, window_params = [{transform_indices = @transform_0, window_bounds = array<i64: 1, 8, 32>}, {pipeline_mode = #tpu.pipeline_mode<synchronous>, transform_indices = @transform_1, window_bounds = array<i64: 1, 32>}, {pipeline_mode = #tpu.pipeline_mode<synchronous>, transform_indices = @transform_2, window_bounds = array<i64: 1, 32>}, {pipeline_mode = #tpu.pipeline_mode<synchronous>, transform_indices = @transform_3, window_bounds = array<i64: 32, 96>}, {pipeline_mode = #tpu.pipeline_mode<synchronous>, transform_indices = @transform_4, window_bounds = array<i64: 1, 96>}, {pipeline_mode = #tpu.pipeline_mode<synchronous>, transform_indices = @transform_5, window_bounds = array<i64: 4, 8, 32>}, {pipeline_mode = #tpu.pipeline_mode<synchronous>, transform_indices = @transform_6, window_bounds = array<i64: 1, 32>}, {pipeline_mode = #tpu.pipeline_mode<synchronous>, transform_indices = @transform_7, window_bounds = array<i64: 1, 32>}, {pipeline_mode = #tpu.pipeline_mode<synchronous>, transform_indices = @transform_8, window_bounds = array<i64: 1, 32>}, {pipeline_mode = #tpu.pipeline_mode<synchronous>, transform_indices = @transform_9, window_bounds = array<i64: 32, 64>}, {pipeline_mode = #tpu.pipeline_mode<synchronous>, transform_indices = @transform_10, window_bounds = array<i64: 1, 64>}, {pipeline_mode = #tpu.pipeline_mode<synchronous>, transform_indices = @transform_11, window_bounds = array<i64: 64, 32>}, {pipeline_mode = #tpu.pipeline_mode<synchronous>, transform_indices = @transform_12, window_bounds = array<i64: 1, 32>}, {transform_indices = @transform_13, window_bounds = array<i64: 1, 8, 32>}, {transform_indices = @transform_14, window_bounds = array<i64: 1, 4, 8, 8>}]} {
    %c0_i32 = arith.constant 0 : i32
    %0 = arith.cmpi eq, %arg1, %c0_i32 : i32
    %1 = arith.extui %0 : i1 to i32
    %c0_i32_0 = arith.constant 0 : i32
    %2 = arith.cmpi ne, %1, %c0_i32_0 : i32
    scf.if %2 {
      %c0_55 = arith.constant 0 : index
      %c0_56 = arith.constant 0 : index
      %c0_57 = arith.constant 0 : index
      %115 = vector.load %arg2[%c0_55, %c0_56, %c0_57] : memref<1x8x32xf32, #tpu.memory_space<vmem>>, vector<1x8x32xf32>
      %c0_58 = arith.constant 0 : index
      %c0_59 = arith.constant 0 : index
      %c0_60 = arith.constant 0 : index
      %116 = vector.load %arg15[%c0_58, %c0_59, %c0_60] : memref<1x8x32xf32, #tpu.memory_space<vmem>>, vector<1x8x32xf32>
      tpu.vector_store %arg15[%c0_58, %c0_59, %c0_60], %115 {strides = array<i32>} : memref<1x8x32xf32, #tpu.memory_space<vmem>>, vector<1x8x32xf32>,
    } else {
    }
    %c0 = arith.constant 0 : index
    %c0_1 = arith.constant 0 : index
    %c0_2 = arith.constant 0 : index
    %3 = vector.load %arg15[%c0, %c0_1, %c0_2] : memref<1x8x32xf32, #tpu.memory_space<vmem>>, vector<1x8x32xf32>
    %4 = vector.shape_cast %3 : vector<1x8x32xf32> to vector<8x32xf32>
    %c0_3 = arith.constant 0 : index
    %c0_4 = arith.constant 0 : index
    %5 = vector.load %arg3[%c0_3, %c0_4] : memref<1x32xf32, #tpu.memory_space<vmem>>, vector<1x32xf32>
    %c0_5 = arith.constant 0 : index
    %c0_6 = arith.constant 0 : index
    %6 = vector.load %arg4[%c0_5, %c0_6] : memref<1x32xf32, #tpu.memory_space<vmem>>, vector<1x32xf32>
    %cst = arith.constant dense<0.000000e+00> : vector<8xf32>
    %7 = vector.multi_reduction <add>, %4, %cst [1] : vector<8x32xf32> to vector<8xf32>
    %8 = vector.shape_cast %7 : vector<8xf32> to vector<8x1xf32>
    %cst_7 = arith.constant 3.200000e+01 : f32
    %9 = vector.broadcast %cst_7 : f32 to vector<8x1xf32>
    %10 = arith.divf %8, %9 : vector<8x1xf32>
    %11 = vector.broadcast %10 : vector<8x1xf32> to vector<8x32xf32>
    %12 = arith.subf %4, %11 : vector<8x32xf32>
    %13 = arith.mulf %12, %12 : vector<8x32xf32>
    %cst_8 = arith.constant dense<0.000000e+00> : vector<8xf32>
    %14 = vector.multi_reduction <add>, %13, %cst_8 [1] : vector<8x32xf32> to vector<8xf32>
    %15 = vector.shape_cast %14 : vector<8xf32> to vector<8x1xf32>
    %cst_9 = arith.constant 3.200000e+01 : f32
    %16 = vector.broadcast %cst_9 : f32 to vector<8x1xf32>
    %17 = arith.divf %15, %16 : vector<8x1xf32>
    %18 = vector.broadcast %10 : vector<8x1xf32> to vector<8x32xf32>
    %19 = arith.subf %4, %18 : vector<8x32xf32>
    %cst_10 = arith.constant 9.99999974E-6 : f32
    %20 = vector.broadcast %cst_10 : f32 to vector<8x1xf32>
    %21 = arith.addf %17, %20 : vector<8x1xf32>
    %22 = math.rsqrt %21 : vector<8x1xf32>
    %23 = vector.broadcast %22 : vector<8x1xf32> to vector<8x32xf32>
    %24 = arith.mulf %19, %23 : vector<8x32xf32>
    %25 = vector.broadcast %5 : vector<1x32xf32> to vector<8x32xf32>
    %26 = arith.mulf %24, %25 : vector<8x32xf32>
    %27 = vector.broadcast %6 : vector<1x32xf32> to vector<8x32xf32>
    %28 = arith.addf %26, %27 : vector<8x32xf32>
    %29 = arith.truncf %28 : vector<8x32xf32> to vector<8x32xbf16>
    %c0_11 = arith.constant 0 : index
    %c0_12 = arith.constant 0 : index
    %30 = vector.load %arg5[%c0_11, %c0_12] : memref<32x96xbf16, #tpu.memory_space<vmem>>, vector<32x96xbf16>
    %cst_13 = arith.constant dense<0.000000e+00> : vector<8x96xf32>
    %31 = tpu.matmul %29, %30, %cst_13 {dimension_numbers = #tpu.dot_dimension_numbers<[1], [0], [0], [1], [0, 0, 1, 1], [], []>} : vector<8x32xbf16>, vector<32x96xbf16>, vector<8x96xf32> -> vector<8x96xf32>
    %c0_14 = arith.constant 0 : index
    %c0_15 = arith.constant 0 : index
    %32 = vector.load %arg6[%c0_14, %c0_15] : memref<1x96xf32, #tpu.memory_space<vmem>>, vector<1x96xf32>
    %33 = vector.broadcast %32 : vector<1x96xf32> to vector<8x96xf32>
    %34 = arith.addf %31, %33 : vector<8x96xf32>
    %35 = arith.truncf %34 : vector<8x96xf32> to vector<8x96xbf16>
    %36 = vector.extract_strided_slice %35 {offsets = [0, 0], sizes = [8, 24], strides = [1, 1]} : vector<8x96xbf16> to vector<8x24xbf16>
    %37 = vector.extract_strided_slice %35 {offsets = [0, 24], sizes = [8, 24], strides = [1, 1]} : vector<8x96xbf16> to vector<8x24xbf16>
    %38 = vector.extract_strided_slice %35 {offsets = [0, 48], sizes = [8, 24], strides = [1, 1]} : vector<8x96xbf16> to vector<8x24xbf16>
    %39 = vector.extract_strided_slice %35 {offsets = [0, 72], sizes = [8, 24], strides = [1, 1]} : vector<8x96xbf16> to vector<8x24xbf16>
    %40 = vector.shape_cast %36 : vector<8x24xbf16> to vector<1x8x24xbf16>
    %41 = vector.shape_cast %37 : vector<8x24xbf16> to vector<1x8x24xbf16>
    %42 = vector.shape_cast %38 : vector<8x24xbf16> to vector<1x8x24xbf16>
    %43 = vector.shape_cast %39 : vector<8x24xbf16> to vector<1x8x24xbf16>
    %44 = tpu.concatenate %40, %41, %42, %43 in 0 : vector<1x8x24xbf16>, vector<1x8x24xbf16>, vector<1x8x24xbf16>, vector<1x8x24xbf16> -> vector<4x8x24xbf16>
    %45 = vector.extract_strided_slice %44 {offsets = [0, 0, 0], sizes = [4, 8, 8], strides = [1, 1, 1]} : vector<4x8x24xbf16> to vector<4x8x8xbf16>
    %46 = vector.extract_strided_slice %44 {offsets = [0, 0, 8], sizes = [4, 8, 8], strides = [1, 1, 1]} : vector<4x8x24xbf16> to vector<4x8x8xbf16>
    %47 = vector.extract_strided_slice %44 {offsets = [0, 0, 16], sizes = [4, 8, 8], strides = [1, 1, 1]} : vector<4x8x24xbf16> to vector<4x8x8xbf16>
    "tpu.trace_start"() <{level = 10 : i32, message = "hqd,hkd->hqk"}> : () -> ()
    %cst_16 = arith.constant dense<0.000000e+00> : vector<4x8x8xf32>
    %48 = tpu.matmul %45, %46, %cst_16 {dimension_numbers = #tpu.dot_dimension_numbers<[2], [2], [1], [1], [0, 0, 0, 1, 1, 1], [0], [0]>} : vector<4x8x8xbf16>, vector<4x8x8xbf16>, vector<4x8x8xf32> -> vector<4x8x8xf32>
    "tpu.trace_stop"() : () -> ()
    %cst_17 = arith.constant dense<0xFF800000> : vector<4x8xf32>
    %49 = vector.multi_reduction <maximumf>, %48, %cst_17 [2] : vector<4x8x8xf32> to vector<4x8xf32>
    %50 = vector.shape_cast %49 : vector<4x8xf32> to vector<4x8x1xf32>
    %51 = vector.broadcast %50 : vector<4x8x1xf32> to vector<4x8x8xf32>
    %52 = arith.subf %48, %51 : vector<4x8x8xf32>
    %53 = math.exp %52 : vector<4x8x8xf32>
    %cst_18 = arith.constant dense<0.000000e+00> : vector<4x8xf32>
    %54 = vector.multi_reduction <add>, %53, %cst_18 [2] : vector<4x8x8xf32> to vector<4x8xf32>
    %55 = vector.shape_cast %54 : vector<4x8xf32> to vector<4x8x1xf32>
    %56 = tpu.reciprocal %55 {approx = true} : vector<4x8x1xf32> -> vector<4x8x1xf32>
    %57 = vector.broadcast %56 : vector<4x8x1xf32> to vector<4x8x8xf32>
    %58 = arith.mulf %53, %57 : vector<4x8x8xf32>
    %59 = arith.truncf %58 : vector<4x8x8xf32> to vector<4x8x8xbf16>
    %c0_19 = arith.constant 0 : index
    %c0_20 = arith.constant 0 : index
    %c0_21 = arith.constant 0 : index
    %c0_22 = arith.constant 0 : index
    %60 = vector.load %arg16[%c0_19, %c0_20, %c0_21, %c0_22] : memref<1x4x8x8xbf16, #tpu.memory_space<vmem>>, vector<1x4x8x8xbf16>
    %61 = vector.shape_cast %60 : vector<1x4x8x8xbf16> to vector<4x8x8xbf16>
    %62 = vector.shape_cast %59 : vector<4x8x8xbf16> to vector<1x4x8x8xbf16>
    tpu.vector_store %arg16[%c0_19, %c0_20, %c0_21, %c0_22], %62 {strides = array<i32>} : memref<1x4x8x8xbf16, #tpu.memory_space<vmem>>, vector<1x4x8x8xbf16>,
    "tpu.trace_start"() <{level = 10 : i32, message = "hqk,hkd->hqd"}> : () -> ()
    %cst_23 = arith.constant dense<0.000000e+00> : vector<4x8x8xf32>
    %63 = tpu.matmul %59, %47, %cst_23 {dimension_numbers = #tpu.dot_dimension_numbers<[2], [1], [1], [2], [0, 0, 0, 1, 1, 2], [0], [0]>} : vector<4x8x8xbf16>, vector<4x8x8xbf16>, vector<4x8x8xf32> -> vector<4x8x8xf32>
    "tpu.trace_stop"() : () -> ()
    %64 = arith.truncf %63 : vector<4x8x8xf32> to vector<4x8x8xbf16>
    %c0_24 = arith.constant 0 : index
    %c0_25 = arith.constant 0 : index
    %c0_26 = arith.constant 0 : index
    %65 = vector.load %arg7[%c0_24, %c0_25, %c0_26] : memref<4x8x32xbf16, #tpu.memory_space<vmem>>, vector<4x8x32xbf16>
    "tpu.trace_start"() <{level = 10 : i32, message = "hsd,hdo->hso"}> : () -> ()
    %cst_27 = arith.constant dense<0.000000e+00> : vector<4x8x32xf32>
    %66 = tpu.matmul %64, %65, %cst_27 {dimension_numbers = #tpu.dot_dimension_numbers<[2], [1], [1], [2], [0, 0, 0, 1, 1, 2], [0], [0]>} : vector<4x8x8xbf16>, vector<4x8x32xbf16>, vector<4x8x32xf32> -> vector<4x8x32xf32>
    "tpu.trace_stop"() : () -> ()
    %cst_28 = arith.constant dense<0.000000e+00> : vector<8x32xf32>
    %67 = vector.multi_reduction <add>, %66, %cst_28 [0] : vector<4x8x32xf32> to vector<8x32xf32>
    %c0_29 = arith.constant 0 : index
    %c0_30 = arith.constant 0 : index
    %68 = vector.load %arg8[%c0_29, %c0_30] : memref<1x32xf32, #tpu.memory_space<vmem>>, vector<1x32xf32>
    %69 = vector.broadcast %68 : vector<1x32xf32> to vector<8x32xf32>
    %70 = arith.addf %67, %69 : vector<8x32xf32>
    %c0_31 = arith.constant 0 : index
    %c0_32 = arith.constant 0 : index
    %71 = vector.load %arg9[%c0_31, %c0_32] : memref<1x32xf32, #tpu.memory_space<vmem>>, vector<1x32xf32>
    %c0_33 = arith.constant 0 : index
    %c0_34 = arith.constant 0 : index
    %72 = vector.load %arg10[%c0_33, %c0_34] : memref<1x32xf32, #tpu.memory_space<vmem>>, vector<1x32xf32>
    %cst_35 = arith.constant dense<0.000000e+00> : vector<8xf32>
    %73 = vector.multi_reduction <add>, %70, %cst_35 [1] : vector<8x32xf32> to vector<8xf32>
    %74 = vector.shape_cast %73 : vector<8xf32> to vector<8x1xf32>
    %cst_36 = arith.constant 3.200000e+01 : f32
    %75 = vector.broadcast %cst_36 : f32 to vector<8x1xf32>
    %76 = arith.divf %74, %75 : vector<8x1xf32>
    %77 = vector.broadcast %76 : vector<8x1xf32> to vector<8x32xf32>
    %78 = arith.subf %70, %77 : vector<8x32xf32>
    %79 = arith.mulf %78, %78 : vector<8x32xf32>
    %cst_37 = arith.constant dense<0.000000e+00> : vector<8xf32>
    %80 = vector.multi_reduction <add>, %79, %cst_37 [1] : vector<8x32xf32> to vector<8xf32>
    %81 = vector.shape_cast %80 : vector<8xf32> to vector<8x1xf32>
    %cst_38 = arith.constant 3.200000e+01 : f32
    %82 = vector.broadcast %cst_38 : f32 to vector<8x1xf32>
    %83 = arith.divf %81, %82 : vector<8x1xf32>
    %84 = vector.broadcast %76 : vector<8x1xf32> to vector<8x32xf32>
    %85 = arith.subf %70, %84 : vector<8x32xf32>
    %cst_39 = arith.constant 9.99999974E-6 : f32
    %86 = vector.broadcast %cst_39 : f32 to vector<8x1xf32>
    %87 = arith.addf %83, %86 : vector<8x1xf32>
    %88 = math.rsqrt %87 : vector<8x1xf32>
    %89 = vector.broadcast %88 : vector<8x1xf32> to vector<8x32xf32>
    %90 = arith.mulf %85, %89 : vector<8x32xf32>
    %91 = vector.broadcast %71 : vector<1x32xf32> to vector<8x32xf32>
    %92 = arith.mulf %90, %91 : vector<8x32xf32>
    %93 = vector.broadcast %72 : vector<1x32xf32> to vector<8x32xf32>
    %94 = arith.addf %92, %93 : vector<8x32xf32>
    %95 = arith.truncf %94 : vector<8x32xf32> to vector<8x32xbf16>
    %c0_40 = arith.constant 0 : index
    %c0_41 = arith.constant 0 : index
    %96 = vector.load %arg11[%c0_40, %c0_41] : memref<32x64xbf16, #tpu.memory_space<vmem>>, vector<32x64xbf16>
    %cst_42 = arith.constant dense<0.000000e+00> : vector<8x64xf32>
    %97 = tpu.matmul %95, %96, %cst_42 {dimension_numbers = #tpu.dot_dimension_numbers<[1], [0], [0], [1], [0, 0, 1, 1], [], []>} : vector<8x32xbf16>, vector<32x64xbf16>, vector<8x64xf32> -> vector<8x64xf32>
    %c0_43 = arith.constant 0 : index
    %c0_44 = arith.constant 0 : index
    %98 = vector.load %arg12[%c0_43, %c0_44] : memref<1x64xf32, #tpu.memory_space<vmem>>, vector<1x64xf32>
    %99 = vector.broadcast %98 : vector<1x64xf32> to vector<8x64xf32>
    %100 = arith.addf %97, %99 : vector<8x64xf32>
    %cst_45 = arith.constant 0.000000e+00 : f32
    %101 = vector.broadcast %cst_45 : f32 to vector<8x64xf32>
    %102 = arith.cmpf ogt, %100, %101 : vector<8x64xf32>
    %cst_46 = arith.constant 0.00999999977 : f32
    %103 = vector.broadcast %cst_46 : f32 to vector<8x64xf32>
    %104 = arith.mulf %103, %100 : vector<8x64xf32>
    %105 = arith.select %102, %100, %104 : vector<8x64xi1>, vector<8x64xf32>
    %106 = arith.truncf %105 : vector<8x64xf32> to vector<8x64xbf16>
    %c0_47 = arith.constant 0 : index
    %c0_48 = arith.constant 0 : index
    %107 = vector.load %arg13[%c0_47, %c0_48] : memref<64x32xbf16, #tpu.memory_space<vmem>>, vector<64x32xbf16>
    %cst_49 = arith.constant dense<0.000000e+00> : vector<8x32xf32>
    %108 = tpu.matmul %106, %107, %cst_49 {dimension_numbers = #tpu.dot_dimension_numbers<[1], [0], [0], [1], [0, 0, 1, 1], [], []>} : vector<8x64xbf16>, vector<64x32xbf16>, vector<8x32xf32> -> vector<8x32xf32>
    %c0_50 = arith.constant 0 : index
    %c0_51 = arith.constant 0 : index
    %109 = vector.load %arg14[%c0_50, %c0_51] : memref<1x32xf32, #tpu.memory_space<vmem>>, vector<1x32xf32>
    %110 = vector.broadcast %109 : vector<1x32xf32> to vector<8x32xf32>
    %111 = arith.addf %108, %110 : vector<8x32xf32>
    %c0_52 = arith.constant 0 : index
    %c0_53 = arith.constant 0 : index
    %c0_54 = arith.constant 0 : index
    %112 = vector.load %arg15[%c0_52, %c0_53, %c0_54] : memref<1x8x32xf32, #tpu.memory_space<vmem>>, vector<1x8x32xf32>
    %113 = vector.shape_cast %112 : vector<1x8x32xf32> to vector<8x32xf32>
    %114 = vector.shape_cast %111 : vector<8x32xf32> to vector<1x8x32xf32>
    tpu.vector_store %arg15[%c0_52, %c0_53, %c0_54], %114 {strides = array<i32>} : memref<1x8x32xf32, #tpu.memory_space<vmem>>, vector<1x8x32xf32>,
    return
  }
  func.func @transform_0(%arg0: i32, %arg1: i32) -> (i32, i32, i32) {
    %c0_i32 = arith.constant 0 : i32
    %c0_i32_0 = arith.constant 0 : i32
    %c0_i32_1 = arith.constant 0 : i32
    return %arg0, %c0_i32, %c0_i32_0 : i32, i32, i32
  }
  func.func @transform_1(%arg0: i32, %arg1: i32) -> (i32, i32) {
    %c0_i32 = arith.constant 0 : i32
    %c0_i32_0 = arith.constant 0 : i32
    %c0_i32_1 = arith.constant 0 : i32
    return %c0_i32, %c0_i32_0 : i32, i32
  }
  func.func @transform_2(%arg0: i32, %arg1: i32) -> (i32, i32) {
    %c0_i32 = arith.constant 0 : i32
    %c0_i32_0 = arith.constant 0 : i32
    %c0_i32_1 = arith.constant 0 : i32
    return %c0_i32, %c0_i32_0 : i32, i32
  }
  func.func @transform_3(%arg0: i32, %arg1: i32) -> (i32, i32) {
    %c0_i32 = arith.constant 0 : i32
    %c0_i32_0 = arith.constant 0 : i32
    %c0_i32_1 = arith.constant 0 : i32
    return %c0_i32, %c0_i32_0 : i32, i32
  }
  func.func @transform_4(%arg0: i32, %arg1: i32) -> (i32, i32) {
    %c0_i32 = arith.constant 0 : i32
    %c0_i32_0 = arith.constant 0 : i32
    %c0_i32_1 = arith.constant 0 : i32
    return %c0_i32, %c0_i32_0 : i32, i32
  }
  func.func @transform_5(%arg0: i32, %arg1: i32) -> (i32, i32, i32) {
    %c0_i32 = arith.constant 0 : i32
    %c0_i32_0 = arith.constant 0 : i32
    %c0_i32_1 = arith.constant 0 : i32
    %c0_i32_2 = arith.constant 0 : i32
    return %c0_i32, %c0_i32_0, %c0_i32_1 : i32, i32, i32
  }
  func.func @transform_6(%arg0: i32, %arg1: i32) -> (i32, i32) {
    %c0_i32 = arith.constant 0 : i32
    %c0_i32_0 = arith.constant 0 : i32
    %c0_i32_1 = arith.constant 0 : i32
    return %c0_i32, %c0_i32_0 : i32, i32
  }
  func.func @transform_7(%arg0: i32, %arg1: i32) -> (i32, i32) {
    %c0_i32 = arith.constant 0 : i32
    %c0_i32_0 = arith.constant 0 : i32
    %c0_i32_1 = arith.constant 0 : i32
    return %c0_i32, %c0_i32_0 : i32, i32
  }
  func.func @transform_8(%arg0: i32, %arg1: i32) -> (i32, i32) {
    %c0_i32 = arith.constant 0 : i32
    %c0_i32_0 = arith.constant 0 : i32
    %c0_i32_1 = arith.constant 0 : i32
    return %c0_i32, %c0_i32_0 : i32, i32
  }
  func.func @transform_9(%arg0: i32, %arg1: i32) -> (i32, i32) {
    %c0_i32 = arith.constant 0 : i32
    %c0_i32_0 = arith.constant 0 : i32
    %c0_i32_1 = arith.constant 0 : i32
    return %c0_i32, %c0_i32_0 : i32, i32
  }
  func.func @transform_10(%arg0: i32, %arg1: i32) -> (i32, i32) {
    %c0_i32 = arith.constant 0 : i32
    %c0_i32_0 = arith.constant 0 : i32
    %c0_i32_1 = arith.constant 0 : i32
    return %c0_i32, %c0_i32_0 : i32, i32
  }
  func.func @transform_11(%arg0: i32, %arg1: i32) -> (i32, i32) {
    %c0_i32 = arith.constant 0 : i32
    %c0_i32_0 = arith.constant 0 : i32
    %c0_i32_1 = arith.constant 0 : i32
    return %c0_i32, %c0_i32_0 : i32, i32
  }
  func.func @transform_12(%arg0: i32, %arg1: i32) -> (i32, i32) {
    %c0_i32 = arith.constant 0 : i32
    %c0_i32_0 = arith.constant 0 : i32
    %c0_i32_1 = arith.constant 0 : i32
    return %c0_i32, %c0_i32_0 : i32, i32
  }
  func.func @transform_13(%arg0: i32, %arg1: i32) -> (i32, i32, i32) {
    %c0_i32 = arith.constant 0 : i32
    %c0_i32_0 = arith.constant 0 : i32
    %c0_i32_1 = arith.constant 0 : i32
    return %arg0, %c0_i32, %c0_i32_0 : i32, i32, i32
  }
  func.func @transform_14(%arg0: i32, %arg1: i32) -> (i32, i32, i32, i32) {
    %c2_i32 = arith.constant 2 : i32
    %0 = arith.muli %arg0, %c2_i32 : i32
    %1 = arith.addi %0, %arg1 : i32
    %c0_i32 = arith.constant 0 : i32
    %c0_i32_0 = arith.constant 0 : i32
    %c0_i32_1 = arith.constant 0 : i32
    %c0_i32_2 = arith.constant 0 : i32
    return %1, %c0_i32, %c0_i32_0, %c0_i32_1 : i32, i32, i32, i32
  }
}

</mosaic_0001>

<bundles_post_ra>
// kernel: transformer_decoder_forward.1
= control target key start
LH: loop header
LB: loop body
LE: loop exit
PB: predicated region body
PF: predicated region fallthrough
CT: control target
= control target key end

     0   :  { %s2370_s0 = inlined_call_operand.vmem [shape: f32[2,8,32], index: 0, kind: input, shape index: {}]   ;;  %s2371_s1 = inlined_call_operand.vmem [shape: f32[1,32], index: 1, kind: input, shape index: {}]   ;;  %s2372_s2 = inlined_call_operand.vmem [shape: f32[1,32], index: 2, kind: input, shape index: {}]   ;;  %s2373_s3 = inlined_call_operand.vmem [shape: bf16[32,96], index: 3, kind: input, shape index: {}]   ;;  %s2374_s4 = inlined_call_operand.vmem [shape: f32[1,96], index: 4, kind: input, shape index: {}]   ;;  %s2375_s5 = inlined_call_operand.vmem [shape: bf16[4,8,32], index: 5, kind: input, shape index: {}]   ;;  %s2376_s6 = inlined_call_operand.vmem [shape: f32[1,32], index: 6, kind: input, shape index: {}]   ;;  %s2377_s7 = inlined_call_operand.vmem [shape: f32[1,32], index: 7, kind: input, shape index: {}]   ;;  %s2378_s8 = inlined_call_operand.vmem [shape: f32[1,32], index: 8, kind: input, shape index: {}]   ;;  %s2379_s9 = inlined_call_operand.vmem [shape: bf16[32,64], index: 9, kind: input, shape index: {}]   ;;  %s2380_s10 = inlined_call_operand.vmem [shape: f32[1,64], index: 10, kind: input, shape index: {}]   ;;  %s2381_s11 = inlined_call_operand.vmem [shape: bf16[64,32], index: 11, kind: input, shape index: {}]   ;;  %s2382_s12 = inlined_call_operand.vmem [shape: f32[1,32], index: 12, kind: input, shape index: {}]   ;;  %s2383_s13 = inlined_call_operand.hbm [shape: f32[2,8,32], index: 13, kind: output, shape index: {0}]   ;;  %s2384_s14 = inlined_call_operand.vmem [shape: bf16[4,4,8,8], index: 14, kind: output, shape index: {1}]  }
   0x1   :  { %2394 = sst [smem:[#allocation14_spill]] %s2382_s12 }
   0x2   :  { %2395 = sst [smem:[#allocation15_spill]] %s2383_s13 }
   0x3   :  { %20 = vsyncpa [#allocation3], 0 }
   0x4   :  { %22 = vsyncpa [#allocation3 + $0x1], 0  ;;  %s2033_s29 = smov 0   ;;  %s2035_s30 = smov 0  }
   0x5   :  { %s2037_s15 = smov 0   ;;  %s2039_s16 = smov 0  }
   0x6   :  { %s2041_s17 = smov 0   ;;  %s2043_s18 = smov 0  }
   0x7   :  { %s2045_s19 = smov 0   ;;  %s2047_s20 = smov 0  }
   0x8 LB: > { %2396 = sst [smem:[#allocation5_spill]] %s1920_s29  ;;  %s1566_s21 = sadd.s32 4294967295, %s1948_s20   ;;  %s1948_s20 = sphi %s2047_s20, %s28_s20   ;;  %s1944_s19 = sphi %s2045_s19, %s2417_s19   ;;  %s1940_s18 = sphi %s2043_s18, %s2416_s18   ;;  %s1936_s17 = sphi %s2041_s17, %s2415_s17   ;;  %s1932_s16 = sphi %s2039_s16, %s2414_s16   ;;  %s1928_s15 = sphi %s2037_s15, %s2413_s15   ;;  %s1924_s30 = sphi %s2035_s30, %s2419_s30   ;;  %s1920_s29 = sphi %s2033_s29, %s2418_s29  }
   0x9   : > { %2397 = sst [smem:[#allocation6_spill]] %s1928_s15  ;;  %s1567_s22 = sadd.s32 4294967294, %s1948_s20  }
   0xa   : > { %2398 = sst [smem:[#allocation7_spill]] %s1940_s18  ;;  %s37_s23 = sadd.s32 1, %s1940_s18 }
   0xb   : > { %2399 = sst [smem:[#allocation8_spill]] %s1944_s19  ;;  %p38_p0 = scmp.ge.s32.totalorder %s37_s23, 2 }
   0xc   : > { %2400 = sst [smem:[#allocation9_spill]] %s1948_s20  ;;  %s40_s24 = sadd.s32 1, %s1944_s19 }
   0xd   : > { %p335_p1 = scmp.ne.s32.totalorder %s1928_s15, %s1924_s30  ;;  %p336_p2 = scmp.eq.s32.totalorder %s1566_s21, 3 }
   0xe   : > { %s2421_s23 = smov (%p38_p0, %s37_s23), 0  ;;  %s2423_s24 = smov (!%p38_p0, %s40_s24), %s1944_s19 }
   0xf   : > { %2401 = sst [smem:[#allocation10_spill]] %s2421_s23  ;;  %p2082_p3 = por %p336_p2, %p335_p1 }
  0x10   : > { %p341_p4 = scmp.ne.s32.totalorder %s1924_s30, %s1920_s29  ;;  %p42_p5 = scmp.ge.s32.totalorder %s2423_s24, 2 }
  0x11   : > { %p342_p6 = scmp.eq.s32.totalorder %s1567_s22, 3  ;;  %p1572_p7 = scmp.ge.s32.totalorder %s1948_s20, 1 }
  0x12   : > { %p433_p8 = scmp.lt.s32.totalorder %s1948_s20, 5  ;;  %s2425_s24 = smov (%p42_p5, %s2423_s24), 0 }
  0x13   : > { %2403 = sst [smem:[#allocation11_spill]] %s2425_s24  ;;  %p2092_p9 = por %p342_p6, %p341_p4 }
  0x14   : > { %p434_p10 = pnand %p1572_p7, %p433_p8  ;;  %s322_s27 = ssub.s32 %s1944_s19, %s2425_s24 }
  0x15   : > { %s2404_s26 = scalar_select %p2092_p9, 1, 0 }
  0x16   : > { %s325_s28 = sadd.s32 1, %s1928_s15  ;;  %p323_p11 = scmp.eq.s32.totalorder %s322_s27, 0 }
  0x17   : > { %2405 = sst [smem:[#allocation12_spill]] %s2404_s26  ;;  %437 = sbr.rel (%p434_p10) target bundleno = 2416 (0x970), region = 72 }
  0x18   : > { %s2100_s21 = scalar_select %p323_p11, %s1928_s15, %s325_s28  }
  0x19   : > { %s473_s22 = sand.u32 (!%p434_p10), 1, %s1924_s30   ;;  %p485_p12 = scmp.lt.s32.totalorder (!%p434_p10), %s1936_s17, 1 }
  0x1a   : > { %2406 = sst [smem:[#allocation13_spill]] %s2100_s21  ;;  %s1573_s23 = sshll.u32 (!%p434_p10), %s473_s22, 3 }
  0x1b   : > { %s1575_s18 = sshll.u32 (!%p434_p10), %s1936_s17, 1  ;;  %s2117_s12 = scalar_lea.vmem (!%p434_p10), [#allocation2], %s1573_s23 }
  0x1c   : > { %s490_s29 = sadd.s32 %s1932_s16, %s1575_s18  ;;  %p1578_p0 = scmp.ne.s32.totalorder %s1932_s16, 0 }
  0x1d   : > { %s486_s26 = scalar_select %p485_p12, %s1936_s17, 1 }
  0x1e   : > { %p491_p13 = scmp.lt.s32.totalorder %s490_s29, 3  ;;  %502 = sbr.rel (%p1578_p0) target bundleno = 37 (0x25), region = 76 }
  0x1f   : > { %s1574_s24 = sshll.u32 %s486_s26, 3 }
  0x20   : > { %s488_s28 = scalar_lea.vmem %s2370_s0, %s1574_s24  ;;  %s2427_s29 = smov (!%p491_p13, %s490_s29), 3 }
  0x21   : > { %s1614_s21 = sshll.u32 %s2427_s29, 4 }
  0x22   : > { %s2115_s13 = scalar_lea.vmem %s2384_s14, %s1614_s21 }
  0x23   : > { %v503_v0 = vld [vmem:[%s488_s28] sm:$0xff]  ;;  %vm504_vm0 = vcmask 261120  }
  0x24   : > { %505 = vst.msk [vmem:[%s2117_s12] sm:$0xff] %vm504_vm0, %v503_v0 }
  0x25 PF: > { %vm509_vm1 = vcmask 261120   ;;  %v1828_v8 = vld [vmem:[%s2373_s3 + $0x8] sm:$0xff]   ;;  %v1950_v9 = vmov 0.0   ;;  %vm1951_vm2 = vmmov 0   ;;  %v1829_v10 = vld [vmem:[%s2373_s3] sm:$0xff]   ;;  %s1952_s27 = smov 56  }
  0x26   : > { %1650 = vmatprep.subr.bf16.mxu1 %v1950_v9  ;;  %1654 = vmatprep.mubr.msk.bf16.mxu1 %vm1951_vm2, %v1950_v9  ;;  %v1579_v15 = vld [vmem:[%s2371_s1] ss:$0 sm:$0xff]  ;;  %s1953_s28 = smov 104   ;;  %s1954_s29 = smov 80   ;;  %vm615_vm3 = vcmask 64512   ;;  %vm864_vm4 = vcmask 1043456  }
  0x27   : > { %1651 = vmatpush3.bf16.msra.mxu1 %v1828_v8  ;;  %1664 = vmatprep.subr.bf16.mxu0 %v1950_v9  ;;  %v1580_v17 = vld [vmem:[%s2372_s2] ss:$0 sm:$0xff]  ;;  %s1955_s15 = smov 120   ;;  %s1956_s16 = smov 112   ;;  %vm854_vm5 = vcmask 60416   ;;  %vm1398_vm7 = vcmask 523264  }
  0x28   : > { %1652 = vmatprep.subr.bf16.mxu1 %v1950_v9  ;;  %1666 = vmatprep.mubr.msk.bf16.mxu0 %vm1951_vm2, %v1950_v9  ;;  %v1581_v21 = vld [vmem:[%s2374_s4] ss:$0 sm:$0xff]  ;;  %s2407_s24 = sld [smem:[#allocation14_spill]]  ;;  %s1611_s26 = sshll.u32 %s1936_s17, 7 }
  0x2b   : > { %v506_v1 = vld [vmem:[%s2117_s12] sm:$0xff]  ;;  %1653 = vmatpush3.bf16.msra.mxu1 %v1829_v10 }
  0x2c   : > { %v510_v2 = vsel %vm509_vm1, %v506_v1, 0.0  ;;  %1658 = vmatprep.subr.bf16.mxu1 %v1950_v9 }
  0x2d   : > { %511 = vadd.xlane.f32.xlu0 %v510_v2 }
  0xb6   : > { %v512_v3 = vpop.xlane.xlu0 %511 }
  0xb7   : > { %v514_v4 = vmul.f32 0.03125, %v512_v3 }
  0xb9   : > { %v515_v5 = vsub.f32 %v506_v1, %v514_v4 }
  0xbb   : > { %v516_v6 = vmul.f32 %v515_v5, %v515_v5 }
  0xbd   : > { %v517_v7 = vsel %vm509_vm1, %v516_v6, 0.0 }
  0xbe   : > { %518 = vadd.xlane.f32.xlu0 %v517_v7 }
 0x147   : > { %v519_v11 = vpop.xlane.xlu0 %518 }
 0x148   : > { %v520_v12 = vmul.f32 0.03125, %v519_v11 }
 0x14a   : > { %v521_v13 = vadd.f32 1e-05, %v520_v12 }
 0x14c   : > { %1836 = vrsqrt.f32 %v521_v13 }
 0x159   : > { %v1837_v14 = vpop.eup %1836 }
 0x15a   : > { %v523_v16 = vmul.f32 %v1837_v14, %v515_v5 }
 0x15c   : > { %v530_v18 = vmul.f32 %v1579_v15, %v523_v16 }
 0x15e   : > { %v537_v19 = vadd.f32 %v1580_v17, %v530_v18 }
 0x160   : > { %v538_v20 = vpack.c.bf16 %v537_v19, %v537_v19 }
 0x162   : > { %1655 = vmatmul.mubr.msk.bf16.vlgmr.msra.gmra.mxu1 %vm509_vm1, %v538_v20 }
 0x163   : > { %1660 = vmatprep.mubr.msk.bf16.mxu1 %vm1951_vm2, %v1950_v9 }
 0x222   : > { %v599_v22 = vpop.f32.mrf.mxu1 }
 0x223   : > { %v600_v23 = vadd.f32 %v1581_v21, %v599_v22 }
 0x224   : > { %v1656_v24 = vpop.f32.mrf.mxu1 }
 0x225   : > { %v2150_v25 = vpack.c.bf16 %v600_v23, %v600_v23 }
 0x226   : > { %v602_v26 = vpop.f32.mrf.mxu1 }
 0x227   : > { %611 = vrot.lane.b32.xlu0 %v2150_v25, %s1952_s27  ;;  %607 = vrot.lane.b32.xlu1 %v2150_v25, %s1953_s28  ;;  %s2408_s28 = sld [smem:[#allocation15_spill]] }
 0x228   : > { %v1657_v27 = vpop.f32.mrf.mxu1 }
 0x22b   : > { %609 = vrot.lane.b32.xlu1 %v2150_v25, %s1954_s29 }
 0x22d   : > { %s2314_s29 = scalar_lea.hbm %s2408_s28, %s1611_s26 }
 0x22f   : > { %613 = vrot.lane.b32.xlu1 %v2150_v25, %s1955_s15 }
 0x299   : > { %v2156_v28 = vpop.permute.xlu1 %607  ;;  %v2162_v30 = vpop.permute.xlu0 %611 }
 0x29a   : > { %662 = vrot.lane.b32.xlu1 %v2156_v28, %s1955_s15 }
 0x29d   : > { %v2159_v29 = vpop.permute.xlu1 %609 }
 0x29e   : > { %710 = vrot.lane.b32.xlu1 %v2159_v29, %s1955_s15 }
 0x2a1   : > { %v614_v31 = vpop.permute.xlu1 %613 }
 0x2a2   : > { %v620_v32 = vsel %vm615_vm3, %v614_v31, 0  ;;  %758 = vrot.lane.b32.xlu1 %v2162_v30, %s1955_s15  ;;  %s1444_s15 = scalar_lea.sflag [#allocation3], %s473_s22 }
 0x2a3   : > { %1659 = vmatpush3.bf16.xpose.msra.mxu1 %v620_v32 }
 0x2a4   : > { %1670 = vmatprep.subr.bf16.mxu1 %v1950_v9 }
 0x2aa   : > { %1661 = vmatmul.mubr.msk.bf16.vlgmr.msra.gmra.mxu1 %vm615_vm3, %v2150_v25 }
 0x2ab   : > { %1672 = vmatprep.mubr.msk.bf16.mxu1 %vm1951_vm2, %v1950_v9 }
 0x30c   : > { %v663_v33 = vpop.permute.xlu1 %662 }
 0x30d   : > { %v668_v34 = vsel %vm615_vm3, %v663_v33, 0 }
 0x30e   : > { %1665 = vmatpush3.bf16.xpose.msra.mxu0 %v668_v34  ;;  %v1056_v34 = vld [vmem:[%s2375_s5] sm:$0xf] }
 0x30f   : > { %1676 = vmatprep.subr.bf16.mxu0 %v1950_v9 }
 0x310   : > { %v711_v35 = vpop.permute.xlu1 %710 }
 0x311   : > { %v716_v36 = vsel %vm615_vm3, %v711_v35, 0 }
 0x312   : > { %1671 = vmatpush3.bf16.xpose.msra.mxu1 %v716_v36 }
 0x313   : > { %1682 = vmatprep.subr.bf16.mxu1 %v1950_v9 }
 0x314   : > { %v759_v37 = vpop.permute.xlu1 %758 }
 0x315   : > { %v764_v38 = vsel %vm615_vm3, %v759_v37, 0  ;;  %1667 = vmatmul.mubr.msk.bf16.vlgmr.msra.gmra.mxu0 %vm615_vm3, %v2156_v28 }
 0x316   : > { %1677 = vmatpush3.bf16.xpose.msra.mxu0 %v764_v38  ;;  %1678 = vmatprep.mubr.msk.bf16.mxu0 %vm1951_vm2, %v1950_v9  ;;  %v1064_v38 = vsel %vm864_vm4, %v1056_v34, 0 }
 0x317   : > { %1688 = vmatprep.subr.bf16.mxu0 %v1950_v9 }
 0x319   : > { %1673 = vmatmul.mubr.msk.bf16.vlgmr.msra.gmra.mxu1 %vm615_vm3, %v2159_v29 }
 0x31a   : > { %1684 = vmatprep.mubr.msk.bf16.mxu1 %vm1951_vm2, %v1950_v9 }
 0x31d   : > { %1679 = vmatmul.mubr.msk.bf16.vlgmr.msra.gmra.mxu0 %vm615_vm3, %v2162_v30 }
 0x31e   : > { %1690 = vmatprep.mubr.msk.bf16.mxu0 %vm1951_vm2, %v1950_v9 }
 0x36a   : > { %v656_v39 = vpop.f32.mrf.mxu1 }
 0x36b   : > { %v806_v40 = vsel %vm615_vm3, %v656_v39, -inf }
 0x36c   : > { %807 = vmax.xlane.f32.xlu1 %v806_v40  ;;  %v1662_v41 = vpop.f32.mrf.mxu1  ;;  %v1057_v40 = vld [vmem:[%s2375_s5 + $0x4] sm:$0xf] }
 0x36e   : > { %v659_v42 = vpop.f32.mrf.mxu1 }
 0x370   : > { %v1663_v43 = vpop.f32.mrf.mxu1 }
 0x371   : > { %v1110_v43 = vsel %vm864_vm4, %v1057_v40, 0 }
 0x3d5   : > { %v704_v44 = vpop.f32.mrf.mxu0 }
 0x3d6   : > { %v809_v45 = vsel %vm615_vm3, %v704_v44, -inf }
 0x3d7   : > { %810 = vmax.xlane.f32.xlu0 %v809_v45  ;;  %v1668_v46 = vpop.f32.mrf.mxu0 }
 0x3d9   : > { %v707_v47 = vpop.f32.mrf.mxu0  ;;  %v752_v48 = vpop.f32.mrf.mxu1 }
 0x3da   : > { %v812_v49 = vsel %vm615_vm3, %v752_v48, -inf }
 0x3db   : > { %v1669_v50 = vpop.f32.mrf.mxu0  ;;  %813 = vmax.xlane.f32.xlu1 %v812_v49  ;;  %v1674_v51 = vpop.f32.mrf.mxu1 }
 0x3dc   : > { %v1059_v51 = vld [vmem:[%s2375_s5 + $0xc] sm:$0xf] }
 0x3dd   : > { %v755_v52 = vpop.f32.mrf.mxu1  ;;  %v800_v53 = vpop.f32.mrf.mxu0 }
 0x3de   : > { %v815_v54 = vsel %vm615_vm3, %v800_v53, -inf }
 0x3df   : > { %816 = vmax.xlane.f32.xlu0 %v815_v54  ;;  %v1675_v55 = vpop.f32.mrf.mxu1  ;;  %v1680_v56 = vpop.f32.mrf.mxu0  ;;  %v1202_v54 = vsel %vm864_vm4, %v1059_v51, 0  ;;  %v1835_v51 = vld [vmem:[%s2381_s11] sm:$0xff]  }
 0x3e1   : > { %v803_v57 = vpop.f32.mrf.mxu0 }
 0x3e3   : > { %v1681_v58 = vpop.f32.mrf.mxu0 }
 0x3ec   : > { %859 = vrot.lane.b32.xlu1 %v2150_v25, %s1956_s16 }
 0x3f5   : > { %v808_v59 = vpop.xlane.xlu1 %807 }
 0x3f6   : > { %v818_v60 = vsub.f32 %v656_v39, %v808_v59 }
 0x3f8   : > { %v822_v61 = vmul.f32 1.442695, %v818_v60 }
 0x3fa   : > { %1838 = vpow2.f32 %v822_v61 }
 0x407   : > { %v1839_v62 = vpop.eup %1838 }
 0x408   : > { %v830_v63 = vsel %vm615_vm3, %v1839_v62, 0.0 }
 0x410   : > { %831 = vadd.xlane.f32.xlu1 %v830_v63 }
 0x460   : > { %v811_v0 = vpop.xlane.xlu0 %810 }
 0x461   : > { %v819_v1 = vsub.f32 %v704_v44, %v811_v0  ;;  %v1058_v44 = vld [vmem:[%s2375_s5 + $0x8] sm:$0xf] }
 0x462   : > { %v1156_v47 = vsel %vm864_vm4, %v1058_v44, 0  ;;  %v1598_v44 = vld [vmem:[%s2377_s7] ss:$0 sm:$0xff] }
 0x463   : > { %v824_v2 = vmul.f32 1.442695, %v819_v1 }
 0x464   : > { %v814_v3 = vpop.xlane.xlu1 %813 }
 0x465   : > { %1840 = vpow2.f32 %v824_v2  ;;  %v820_v4 = vsub.f32 %v752_v48, %v814_v3 }
 0x467   : > { %v826_v5 = vmul.f32 1.442695, %v820_v4 }
 0x468   : > { %v817_v6 = vpop.xlane.xlu0 %816  ;;  %v860_v7 = vpop.permute.xlu1 %859 }
 0x469   : > { %1842 = vpow2.f32 %v826_v5  ;;  %v821_v8 = vsub.f32 %v800_v53, %v817_v6  ;;  %v866_v10 = vsel %vm864_vm4, %v860_v7, 0 }
 0x46a   : > { %1683 = vmatpush3.bf16.msra.mxu1 %v866_v10 }
 0x46b   : > { %v828_v11 = vmul.f32 1.442695, %v821_v8  ;;  %1694 = vmatprep.subr.bf16.mxu1 %v1950_v9 }
 0x46d   : > { %1844 = vpow2.f32 %v828_v11 }
 0x472   : > { %v1841_v12 = vpop.eup %1840 }
 0x473   : > { %v833_v13 = vsel %vm615_vm3, %v1841_v12, 0.0 }
 0x474   : > { %834 = vadd.xlane.f32.xlu0 %v833_v13 }
 0x476   : > { %v1843_v14 = vpop.eup %1842 }
 0x477   : > { %v836_v15 = vsel %vm615_vm3, %v1843_v14, 0.0 }
 0x478   : > { %837 = vadd.xlane.f32.xlu1 %v836_v15 }
 0x47a   : > { %v1845_v16 = vpop.eup %1844 }
 0x47b   : > { %v839_v17 = vsel %vm615_vm3, %v1845_v16, 0.0 }
 0x47c   : > { %840 = vadd.xlane.f32.xlu0 %v839_v17 }
 0x489   : > { %956 = vrot.lane.b32.xlu1 %v2159_v29, %s1956_s16 }
 0x48d   : > { %1004 = vrot.lane.b32.xlu1 %v2162_v30, %s1956_s16 }
 0x492   : > { %908 = vrot.lane.b32.xlu0 %v2156_v28, %s1956_s16  ;;  %s1957_s16 = smov [#allocation2]  }
 0x493   : > { %s1860_s18 = sshll.u32 %s1957_s16, 4  ;;  %s1861_s18 = int_to_ptr.vmem [resolvable:$false] %s1860_s18 }
 0x494   : > { %s1862_s19 = scalar_lea.vmem %s1861_s18, 256 }
 0x499   : > { %v832_v18 = vpop.xlane.xlu1 %831 }
 0x49a   : > { %1846 = vrcp.f32 %v832_v18 }
 0x4a7   : > { %v1847_v19 = vpop.eup %1846 }
 0x4a8   : > { %v846_v20 = vmul.f32 %v1847_v19, %v1839_v62 }
 0x4aa   : > { %v850_v21 = vpack.c.bf16 %v846_v20, %v846_v20 }
 0x4ac   : > { %855 = vst.msk [vmem:[%s2115_s13] sm:$0xf] %vm854_vm5, %v850_v21  ;;  %1685 = vmatmul.mubr.msk.bf16.vlgmr.msra.gmra.mxu1 %vm615_vm3, %v850_v21 }
 0x4ad   : > { %1696 = vmatprep.mubr.msk.bf16.mxu1 %vm1951_vm2, %v1950_v9 }
 0x4fd   : > { %v835_v22 = vpop.xlane.xlu0 %834 }
 0x4fe   : > { %1848 = vrcp.f32 %v835_v22 }
 0x501   : > { %v838_v23 = vpop.xlane.xlu1 %837 }
 0x502   : > { %1850 = vrcp.f32 %v838_v23  ;;  %v1597_v23 = vld [vmem:[%s2376_s6] ss:$0 sm:$0xff] }
 0x505   : > { %v841_v24 = vpop.xlane.xlu0 %840  ;;  %v957_v25 = vpop.permute.xlu1 %956 }
 0x506   : > { %1852 = vrcp.f32 %v841_v24  ;;  %v962_v26 = vsel %vm864_vm4, %v957_v25, 0 }
 0x507   : > { %1695 = vmatpush3.bf16.msra.mxu1 %v962_v26 }
 0x508   : > { %1706 = vmatprep.subr.bf16.mxu1 %v1950_v9 }
 0x509   : > { %v909_v27 = vpop.permute.xlu0 %908  ;;  %v1005_v31 = vpop.permute.xlu1 %1004 }
 0x50a   : > { %v914_v28 = vsel %vm864_vm4, %v909_v27, 0  ;;  %v1010_v35 = vsel %vm864_vm4, %v1005_v31, 0 }
 0x50b   : > { %v1849_v29 = vpop.eup %1848  ;;  %1689 = vmatpush3.bf16.msra.mxu0 %v914_v28 }
 0x50c   : > { %1700 = vmatprep.subr.bf16.mxu0 %v1950_v9  ;;  %v847_v30 = vmul.f32 %v1849_v29, %v1841_v12 }
 0x50e   : > { %v851_v32 = vpack.c.bf16 %v847_v30, %v847_v30 }
 0x50f   : > { %v1851_v33 = vpop.eup %1850 }
 0x510   : > { %856 = vst.msk [vmem:[%s2115_s13 + $0x4] sm:$0xf] %vm854_vm5, %v851_v32  ;;  %1691 = vmatmul.mubr.msk.bf16.vlgmr.msra.gmra.mxu0 %vm615_vm3, %v851_v32  ;;  %v848_v36 = vmul.f32 %v1851_v33, %v1843_v14 }
 0x511   : > { %1701 = vmatpush3.bf16.msra.mxu0 %v1010_v35  ;;  %1702 = vmatprep.mubr.msk.bf16.mxu0 %vm1951_vm2, %v1950_v9 }
 0x512   : > { %v852_v37 = vpack.c.bf16 %v848_v36, %v848_v36  ;;  %1712 = vmatprep.subr.bf16.mxu0 %v1950_v9  ;;  %v1830_v36 = vld [vmem:[%s2379_s9 + $0x8] sm:$0xff]  }
 0x513   : > { %v1853_v39 = vpop.eup %1852 }
 0x514   : > { %857 = vst.msk [vmem:[%s2115_s13 + $0x8] sm:$0xf] %vm854_vm5, %v852_v37  ;;  %1697 = vmatmul.mubr.msk.bf16.vlgmr.msra.gmra.mxu1 %vm615_vm3, %v852_v37  ;;  %v849_v41 = vmul.f32 %v1853_v39, %v1845_v16  ;;  %v1831_v37 = vld [vmem:[%s2379_s9] sm:$0xff]   ;;  %v1833_v39 = vld [vmem:[%s2381_s11 + $0x10] sm:$0xff]  }
 0x515   : > { %1707 = vmatpush3.bf16.msra.mxu1 %v1064_v38  ;;  %1708 = vmatprep.mubr.msk.bf16.mxu1 %vm1951_vm2, %v1950_v9  ;;  %v1832_v38 = vld [vmem:[%s2381_s11 + $0x18] sm:$0xff]  }
 0x516   : > { %v853_v42 = vpack.c.bf16 %v849_v41, %v849_v41  ;;  %1718 = vmatprep.subr.bf16.mxu1 %v1950_v9 }
 0x518   : > { %858 = vst.msk [vmem:[%s2115_s13 + $0xc] sm:$0xf] %vm854_vm5, %v853_v42  ;;  %1703 = vmatmul.mubr.msk.bf16.vlgmr.msra.gmra.mxu0 %vm615_vm3, %v853_v42  ;;  %s1464_s13 = sshll.u32 %s2117_s12, 4  ;;  %s2316_s13 = int_to_ptr.vmem [resolvable:$true] %s1464_s13 }
 0x519   : > { %1713 = vmatpush3.bf16.msra.mxu0 %v1110_v43  ;;  %1714 = vmatprep.mubr.msk.bf16.mxu0 %vm1951_vm2, %v1950_v9  ;;  %s1856_s17 = scalar_lea.vmem %s2316_s13, 128  ;;  %p1863_p5 = scmp.lt.s32.totalorder %s2316_s13, %s1861_s18 }
 0x51a   : > { %1724 = vmatprep.subr.bf16.mxu0 %v1950_v9  ;;  %p1857_p1 = scmp.ne.s32.totalorder %s2316_s13, %s1856_s17  ;;  %p1864_p6 = scmp.lt.s32.totalorder %s1862_s19, %s1856_s17 }
 0x51c   : > { %p1858_p2 = pnand %p1857_p1, %p2082_p3  ;;  %p1865_p7 = por %p1864_p6, %p1863_p5 }
 0x51e   : > { %p1859_p4 = pneg %p1858_p2 }
 0x520   : > { %p1866_p8 = pnand %p1865_p7, %p1859_p4 }
 0x56c   : > { %v902_v45 = vpop.f32.mrf.mxu1 }
 0x56d   : > { %v1052_v46 = vpack.c.bf16 %v902_v45, %v902_v45 }
 0x56e   : > { %v1686_v48 = vpop.f32.mrf.mxu1 }
 0x56f   : > { %1709 = vmatmul.mubr.msk.bf16.vlgmr.msra.gmra.mxu1 %vm615_vm3, %v1052_v46  ;;  %v1599_v46 = vld [vmem:[%s2378_s8] ss:$0 sm:$0xff] }
 0x570   : > { %v905_v49 = vpop.f32.mrf.mxu1  ;;  %1719 = vmatpush3.bf16.msra.mxu1 %v1156_v47  ;;  %1720 = vmatprep.mubr.msk.bf16.mxu1 %vm1951_vm2, %v1950_v9 }
 0x571   : > { %1730 = vmatprep.subr.bf16.mxu1 %v1950_v9 }
 0x572   : > { %v1687_v50 = vpop.f32.mrf.mxu1 }
 0x573   : > { %v1834_v50 = vld [vmem:[%s2381_s11 + $0x8] sm:$0xff]  }
 0x5d0   : > { %v950_v52 = vpop.f32.mrf.mxu0 }
 0x5d1   : > { %v1053_v53 = vpack.c.bf16 %v950_v52, %v950_v52  ;;  %v1600_v52 = vld [vmem:[%s2380_s10] ss:$0 sm:$0xff] }
 0x5d2   : > { %v1692_v55 = vpop.f32.mrf.mxu0 }
 0x5d3   : > { %1715 = vmatmul.mubr.msk.bf16.vlgmr.msra.gmra.mxu0 %vm615_vm3, %v1053_v53 }
 0x5d4   : > { %v953_v56 = vpop.f32.mrf.mxu0  ;;  %v998_v57 = vpop.f32.mrf.mxu1  ;;  %1725 = vmatpush3.bf16.msra.mxu0 %v1202_v54  ;;  %1726 = vmatprep.mubr.msk.bf16.mxu0 %vm1951_vm2, %v1950_v9 }
 0x5d5   : > { %v1054_v58 = vpack.c.bf16 %v998_v57, %v998_v57  ;;  %1738 = vmatprep.subr.bf16.mxu0 %v1950_v9 }
 0x5d6   : > { %v1693_v59 = vpop.f32.mrf.mxu0  ;;  %v1698_v60 = vpop.f32.mrf.mxu1 }
 0x5d7   : > { %1721 = vmatmul.mubr.msk.bf16.vlgmr.msra.gmra.mxu1 %vm615_vm3, %v1054_v58  ;;  %v1604_v60 = vld [vmem:[%s2407_s24] ss:$0 sm:$0xff] }
 0x5d8   : > { %v1001_v61 = vpop.f32.mrf.mxu1  ;;  %v1046_v62 = vpop.f32.mrf.mxu0  ;;  %1734 = vmatprep.mubr.msk.bf16.mxu1 %vm1951_vm2, %v1950_v9  ;;  %1731 = vmatpush3.bf16.msra.mxu1 %v1830_v36 }
 0x5d9   : > { %v1055_v63 = vpack.c.bf16 %v1046_v62, %v1046_v62  ;;  %1732 = vmatprep.subr.bf16.mxu1 %v1950_v9 }
 0x5da   : > { %v1699_v0 = vpop.f32.mrf.mxu1  ;;  %v1704_v1 = vpop.f32.mrf.mxu0 }
 0x5db   : > { %1727 = vmatmul.mubr.msk.bf16.vlgmr.msra.gmra.mxu0 %vm615_vm3, %v1055_v63 }
 0x5dc   : > { %v1049_v2 = vpop.f32.mrf.mxu0  ;;  %1746 = vmatprep.mubr.msk.bf16.mxu0 %vm1951_vm2, %v1950_v9  ;;  %1733 = vmatpush3.bf16.msra.mxu1 %v1831_v37 }
 0x5dd   : > { %1739 = vmatpush3.bf16.msra.mxu0 %v1832_v38 }
 0x5de   : > { %v1705_v3 = vpop.f32.mrf.mxu0  ;;  %1740 = vmatprep.subr.bf16.mxu0 %v1950_v9 }
 0x5e1   : > { %1741 = vmatpush3.bf16.msra.mxu0 %v1833_v39 }
 0x5e2   : > { %1742 = vmatprep.subr.bf16.mxu0 %v1950_v9 }
 0x5e5   : > { %1743 = vmatpush3.bf16.msra.mxu0 %v1834_v50 }
 0x5e6   : > { %1744 = vmatprep.subr.bf16.mxu0 %v1950_v9 }
 0x5e9   : > { %1745 = vmatpush3.bf16.msra.mxu0 %v1835_v51 }
 0x62f   : > { %v1100_v4 = vpop.f32.mrf.mxu1 }
 0x630   : > { %v1244_v14 = vsel %vm509_vm1, %v1100_v4, 0.0 }
 0x631   : > { %v1710_v5 = vpop.f32.mrf.mxu1 }
 0x633   : > { %v1103_v6 = vpop.f32.mrf.mxu1 }
 0x635   : > { %v1711_v7 = vpop.f32.mrf.mxu1 }
 0x693   : > { %v1146_v8 = vpop.f32.mrf.mxu0 }
 0x694   : > { %v1245_v11 = vsel %vm509_vm1, %v1146_v8, 0.0 }
 0x695   : > { %v1716_v10 = vpop.f32.mrf.mxu0  ;;  %v1246_v16 = vadd.f32 %v1245_v11, %v1244_v14 }
 0x697   : > { %v1149_v12 = vpop.f32.mrf.mxu0  ;;  %v1192_v13 = vpop.f32.mrf.mxu1 }
 0x698   : > { %v1247_v15 = vsel %vm509_vm1, %v1192_v13, 0.0 }
 0x699   : > { %v1717_v17 = vpop.f32.mrf.mxu0  ;;  %v1722_v18 = vpop.f32.mrf.mxu1  ;;  %v1248_v19 = vadd.f32 %v1247_v15, %v1246_v16 }
 0x69b   : > { %v1195_v20 = vpop.f32.mrf.mxu1  ;;  %v1238_v21 = vpop.f32.mrf.mxu0 }
 0x69c   : > { %v1249_v22 = vsel %vm509_vm1, %v1238_v21, 0.0 }
 0x69d   : > { %v1250_v24 = vadd.f32 %v1249_v22, %v1248_v19  ;;  %v1723_v25 = vpop.f32.mrf.mxu1  ;;  %v1728_v26 = vpop.f32.mrf.mxu0 }
 0x69f   : > { %v1241_v27 = vpop.f32.mrf.mxu0  ;;  %v1258_v28 = vadd.f32 %v1597_v23, %v1250_v24 }
 0x6a1   : > { %v1729_v29 = vpop.f32.mrf.mxu0  ;;  %v1261_v30 = vsel %vm509_vm1, %v1258_v28, 0.0 }
 0x6a2   : > { %1262 = vadd.xlane.f32.xlu0 %v1261_v30 }
 0x72b   : > { %v1263_v31 = vpop.xlane.xlu0 %1262 }
 0x72c   : > { %v1264_v32 = vmul.f32 0.03125, %v1263_v31 }
 0x72e   : > { %v1265_v33 = vsub.f32 %v1258_v28, %v1264_v32 }
 0x730   : > { %v1266_v34 = vmul.f32 %v1265_v33, %v1265_v33 }
 0x732   : > { %v1267_v35 = vsel %vm509_vm1, %v1266_v34, 0.0 }
 0x733   : > { %1268 = vadd.xlane.f32.xlu1 %v1267_v35 }
 0x7bc   : > { %v1269_v40 = vpop.xlane.xlu1 %1268 }
 0x7bd   : > { %v1270_v41 = vmul.f32 0.03125, %v1269_v40 }
 0x7bf   : > { %v1271_v42 = vadd.f32 1e-05, %v1270_v41 }
 0x7c1   : > { %1854 = vrsqrt.f32 %v1271_v42 }
 0x7ce   : > { %v1855_v43 = vpop.eup %1854 }
 0x7cf   : > { %v1273_v45 = vmul.f32 %v1855_v43, %v1265_v33 }
 0x7d1   : > { %v1280_v47 = vmul.f32 %v1598_v44, %v1273_v45 }
 0x7d3   : > { %v1287_v48 = vadd.f32 %v1599_v46, %v1280_v47 }
 0x7d5   : > { %v1288_v49 = vpack.c.bf16 %v1287_v48, %v1287_v48 }
 0x7d7   : > { %1735 = vmatmul.mubr.msk.bf16.vlgmr.msra.gmra.mxu1 %vm509_vm1, %v1288_v49 }
 0x897   : > { %v1349_v53 = vpop.f32.mrf.mxu1 }
 0x898   : > { %v1350_v54 = vadd.f32 %v1600_v52, %v1349_v53 }
 0x899   : > { %v1736_v55 = vpop.f32.mrf.mxu1 }
 0x89a   : > { %vm1355_vm6 = vcmp.gt.f32.partialorder %v1350_v54, 0.0  ;;  %v1356_v56 = vmul.f32 0.01, %v1350_v54 }
 0x89b   : > { %v1352_v57 = vpop.f32.mrf.mxu1 }
 0x89c   : > { %v1357_v9 = vsel %vm1355_vm6, %v1350_v54, %v1356_v56 }
 0x89d   : > { %v1358_v58 = vpack.c.bf16 %v1357_v9, %v1357_v9  ;;  %v1737_v59 = vpop.f32.mrf.mxu1 }
 0x89f   : > { %1747 = vmatmul.mubr.msk.bf16.vlgmr.msra.gmra.mxu0 %vm1398_vm7, %v1358_v58 }
 0x95f   : > { %v1436_v61 = vpop.f32.mrf.mxu0 }
 0x960   : > { %v1437_v62 = vadd.f32 %v1604_v60, %v1436_v61 }
 0x961   : > { %v1748_v63 = vpop.f32.mrf.mxu0 }
 0x962   : > { %1442 = vst.msk [vmem:[%s2117_s12] sm:$0xff] %vm509_vm1, %v1437_v62 }
 0x963   : > { %v1439_v0 = vpop.f32.mrf.mxu0 }
 0x964   : > { %1869 = shalt.err (!%p1866_p8)
}
 0x965   : > { %s1870_s12 = scalar_lea.hbm %s2314_s29, 128  ;;  %s1874_s23 = scalar_lea.hbm %s2408_s28, 256 }
 0x966   : > { %p1871_p10 = scmp.ne.s32.totalorder %s2314_s29, %s1870_s12  ;;  %p1875_p13 = scmp.lt.s32.totalorder %s2314_s29, %s2408_s28 }
 0x967   : > { %p1876_p0 = scmp.lt.s32.totalorder %s1874_s23, %s1870_s12 }
 0x968   : > { %p1872_p11 = pnand %p1871_p10, %p2082_p3 }
 0x969   : > { %p1877_p1 = por %p1876_p0, %p1875_p13 }
 0x96a   : > { %p1873_p12 = pneg %p1872_p11 }
 0x96c   : > { %p1878_p2 = pnand %p1877_p1, %p1873_p12 }
 0x96e   : > { %1881 = shalt.err (!%p1878_p2)
}
 0x96f   : > { %1750 = dma.vmem_to_hbm [thread:$0]  (%p2082_p3), %s2316_s13, 128, %s2314_s29, %s1444_s15   ;;  %v1749_v1 = vpop.f32.mrf.mxu0 }
 0x970 PF: > { %s2409_s21 = sld [smem:[#allocation9_spill]] }
 0x971   : > { %s2410_s27 = sld [smem:[#allocation5_spill]] }
 0x976   : > { %p1756_p4 = scmp.ge.s32.totalorder %s2409_s21, 2 }
 0x977   : > { %s1481_s16 = sand.u32 1, %s2410_s27  }
 0x978   : > { %p1753_p5 = pnand %p1756_p4, %p2092_p9  ;;  %s1482_s18 = scalar_lea.sflag [#allocation3], %s1481_s16 }
 0x97a   : > { %p1754_p6 = pneg %p1753_p5 }
 0x97c   : > { %1915 = dma.done.wait (%p1754_p6), %s1482_s18, 128  }
 0x97d   : > { %1917 = vsyncadd (%p1754_p6), %s1482_s18, 4294967168  ;;  %s28_s20 = sadd.s32 1, %s2409_s21   ;;  %s2412_s25 = sld [smem:[#allocation6_spill]] }
 0x97e   : > { %p25_p7 = scmp.ge.s32.totalorder %s28_s20, 6   ;;  %s2413_s15 = sld [smem:[#allocation13_spill]] }
 0x97f   : > { %s2414_s16 = sld [smem:[#allocation7_spill]]  ;;  %s2418_s29 = smov %s1924_s30 }
 0x980   : > { %s2415_s17 = sld [smem:[#allocation8_spill]]  ;;  %27 = sbr.rel (!%p25_p7) target bundleno = 8 (0x8), region = 123 }
 0x981   : > { %s2416_s18 = sld [smem:[#allocation10_spill]] }
 0x982   : > { %s2417_s19 = sld [smem:[#allocation11_spill]] }
 0x983   : > { %s2419_s30 = smov %s2412_s25 }
 0x985   :  { %1497 = vsyncpa [#allocation3], 1 }
 0x986   :  { %1499 = vsyncpa [#allocation3 + $0x1], 1 }

// kernel: transformer_decoder_forward.1
= control target key start
LH: loop header
LB: loop body
LE: loop exit
PB: predicated region body
PF: predicated region fallthrough
CT: control target
= control target key end

     0   :  { %s2370_s0 = inlined_call_operand.vmem [shape: f32[2,8,32], index: 0, kind: input, shape index: {}]   ;;  %s2371_s1 = inlined_call_operand.vmem [shape: f32[1,32], index: 1, kind: input, shape index: {}]   ;;  %s2372_s2 = inlined_call_operand.vmem [shape: f32[1,32], index: 2, kind: input, shape index: {}]   ;;  %s2373_s3 = inlined_call_operand.vmem [shape: bf16[32,96], index: 3, kind: input, shape index: {}]   ;;  %s2374_s4 = inlined_call_operand.vmem [shape: f32[1,96], index: 4, kind: input, shape index: {}]   ;;  %s2375_s5 = inlined_call_operand.vmem [shape: bf16[4,8,32], index: 5, kind: input, shape index: {}]   ;;  %s2376_s6 = inlined_call_operand.vmem [shape: f32[1,32], index: 6, kind: input, shape index: {}]   ;;  %s2377_s7 = inlined_call_operand.vmem [shape: f32[1,32], index: 7, kind: input, shape index: {}]   ;;  %s2378_s8 = inlined_call_operand.vmem [shape: f32[1,32], index: 8, kind: input, shape index: {}]   ;;  %s2379_s9 = inlined_call_operand.vmem [shape: bf16[32,64], index: 9, kind: input, shape index: {}]   ;;  %s2380_s10 = inlined_call_operand.vmem [shape: f32[1,64], index: 10, kind: input, shape index: {}]   ;;  %s2381_s11 = inlined_call_operand.vmem [shape: bf16[64,32], index: 11, kind: input, shape index: {}]   ;;  %s2382_s12 = inlined_call_operand.vmem [shape: f32[1,32], index: 12, kind: input, shape index: {}]   ;;  %s2383_s13 = inlined_call_operand.hbm [shape: f32[2,8,32], index: 13, kind: output, shape index: {0}]   ;;  %s2384_s14 = inlined_call_operand.vmem [shape: bf16[4,4,8,8], index: 14, kind: output, shape index: {1}]  }
   0x1   :  { %2394 = sst [smem:[#allocation14_spill]] %s2382_s12 }
   0x2   :  { %2395 = sst [smem:[#allocation15_spill]] %s2383_s13 }
   0x3   :  { %20 = vsyncpa [#allocation3], 0 }
   0x4   :  { %22 = vsyncpa [#allocation3 + $0x1], 0  ;;  %s2033_s29 = smov 0   ;;  %s2035_s30 = smov 0  }
   0x5   :  { %s2037_s15 = smov 0   ;;  %s2039_s16 = smov 0  }
   0x6   :  { %s2041_s17 = smov 0   ;;  %s2043_s18 = smov 0  }
   0x7   :  { %s2045_s19 = smov 0   ;;  %s2047_s20 = smov 0  }
   0x8 LB: > { %2396 = sst [smem:[#allocation5_spill]] %s1920_s29  ;;  %s1566_s21 = sadd.s32 4294967295, %s1948_s20   ;;  %s1948_s20 = sphi %s2047_s20, %s28_s20   ;;  %s1944_s19 = sphi %s2045_s19, %s2417_s19   ;;  %s1940_s18 = sphi %s2043_s18, %s2416_s18   ;;  %s1936_s17 = sphi %s2041_s17, %s2415_s17   ;;  %s1932_s16 = sphi %s2039_s16, %s2414_s16   ;;  %s1928_s15 = sphi %s2037_s15, %s2413_s15   ;;  %s1924_s30 = sphi %s2035_s30, %s2419_s30   ;;  %s1920_s29 = sphi %s2033_s29, %s2418_s29  }
   0x9   : > { %2397 = sst [smem:[#allocation6_spill]] %s1928_s15  ;;  %s1567_s22 = sadd.s32 4294967294, %s1948_s20  }
   0xa   : > { %2398 = sst [smem:[#allocation7_spill]] %s1940_s18  ;;  %s37_s23 = sadd.s32 1, %s1940_s18 }
   0xb   : > { %2399 = sst [smem:[#allocation8_spill]] %s1944_s19  ;;  %p38_p0 = scmp.ge.s32.totalorder %s37_s23, 2 }
   0xc   : > { %2400 = sst [smem:[#allocation9_spill]] %s1948_s20  ;;  %s40_s24 = sadd.s32 1, %s1944_s19 }
   0xd   : > { %p335_p1 = scmp.ne.s32.totalorder %s1928_s15, %s1924_s30  ;;  %p336_p2 = scmp.eq.s32.totalorder %s1566_s21, 3 }
   0xe   : > { %s2421_s23 = smov (%p38_p0, %s37_s23), 0  ;;  %s2423_s24 = smov (!%p38_p0, %s40_s24), %s1944_s19 }
   0xf   : > { %2401 = sst [smem:[#allocation10_spill]] %s2421_s23  ;;  %p2082_p3 = por %p336_p2, %p335_p1 }
  0x10   : > { %p341_p4 = scmp.ne.s32.totalorder %s1924_s30, %s1920_s29  ;;  %p42_p5 = scmp.ge.s32.totalorder %s2423_s24, 2 }
  0x11   : > { %p342_p6 = scmp.eq.s32.totalorder %s1567_s22, 3  ;;  %p1572_p7 = scmp.ge.s32.totalorder %s1948_s20, 1 }
  0x12   : > { %p433_p8 = scmp.lt.s32.totalorder %s1948_s20, 5  ;;  %s2425_s24 = smov (%p42_p5, %s2423_s24), 0 }
  0x13   : > { %2403 = sst [smem:[#allocation11_spill]] %s2425_s24  ;;  %p2092_p9 = por %p342_p6, %p341_p4 }
  0x14   : > { %p434_p10 = pnand %p1572_p7, %p433_p8  ;;  %s322_s27 = ssub.s32 %s1944_s19, %s2425_s24 }
  0x15   : > { %s2404_s26 = scalar_select %p2092_p9, 1, 0 }
  0x16   : > { %s325_s28 = sadd.s32 1, %s1928_s15  ;;  %p323_p11 = scmp.eq.s32.totalorder %s322_s27, 0 }
  0x17   : > { %2405 = sst [smem:[#allocation12_spill]] %s2404_s26  ;;  %437 = sbr.rel (%p434_p10) target bundleno = 2416 (0x970), region = 72 }
  0x18   : > { %s2100_s21 = scalar_select %p323_p11, %s1928_s15, %s325_s28  }
  0x19   : > { %s473_s22 = sand.u32 (!%p434_p10), 1, %s1924_s30   ;;  %p485_p12 = scmp.lt.s32.totalorder (!%p434_p10), %s1936_s17, 1 }
  0x1a   : > { %2406 = sst [smem:[#allocation13_spill]] %s2100_s21  ;;  %s1573_s23 = sshll.u32 (!%p434_p10), %s473_s22, 3 }
  0x1b   : > { %s1575_s18 = sshll.u32 (!%p434_p10), %s1936_s17, 1  ;;  %s2117_s12 = scalar_lea.vmem (!%p434_p10), [#allocation2], %s1573_s23 }
  0x1c   : > { %s490_s29 = sadd.s32 %s1932_s16, %s1575_s18  ;;  %p1578_p0 = scmp.ne.s32.totalorder %s1932_s16, 0 }
  0x1d   : > { %s486_s26 = scalar_select %p485_p12, %s1936_s17, 1 }
  0x1e   : > { %p491_p13 = scmp.lt.s32.totalorder %s490_s29, 3  ;;  %502 = sbr.rel (%p1578_p0) target bundleno = 37 (0x25), region = 76 }
  0x1f   : > { %s1574_s24 = sshll.u32 %s486_s26, 3 }
  0x20   : > { %s488_s28 = scalar_lea.vmem %s2370_s0, %s1574_s24  ;;  %s2427_s29 = smov (!%p491_p13, %s490_s29), 3 }
  0x21   : > { %s1614_s21 = sshll.u32 %s2427_s29, 4 }
  0x22   : > { %s2115_s13 = scalar_lea.vmem %s2384_s14, %s1614_s21 }
  0x23   : > { %v503_v0 = vld [vmem:[%s488_s28] sm:$0xff]  ;;  %vm504_vm0 = vcmask 261120  }
  0x24   : > { %505 = vst.msk [vmem:[%s2117_s12] sm:$0xff] %vm504_vm0, %v503_v0 }
  0x25 PF: > { %vm509_vm1 = vcmask 261120   ;;  %v1828_v8 = vld [vmem:[%s2373_s3 + $0x8] sm:$0xff]   ;;  %v1950_v9 = vmov 0.0   ;;  %vm1951_vm2 = vmmov 0   ;;  %v1829_v10 = vld [vmem:[%s2373_s3] sm:$0xff]   ;;  %s1952_s27 = smov 56  }
  0x26   : > { %1650 = vmatprep.subr.bf16.mxu1 %v1950_v9  ;;  %1654 = vmatprep.mubr.msk.bf16.mxu1 %vm1951_vm2, %v1950_v9  ;;  %v1579_v15 = vld [vmem:[%s2371_s1] ss:$0 sm:$0xff]  ;;  %s1953_s28 = smov 104   ;;  %s1954_s29 = smov 80   ;;  %vm615_vm3 = vcmask 64512   ;;  %vm864_vm4 = vcmask 1043456  }
  0x27   : > { %1651 = vmatpush3.bf16.msra.mxu1 %v1828_v8  ;;  %1664 = vmatprep.subr.bf16.mxu0 %v1950_v9  ;;  %v1580_v17 = vld [vmem:[%s2372_s2] ss:$0 sm:$0xff]  ;;  %s1955_s15 = smov 120   ;;  %s1956_s16 = smov 112   ;;  %vm854_vm5 = vcmask 60416   ;;  %vm1398_vm7 = vcmask 523264  }
  0x28   : > { %1652 = vmatprep.subr.bf16.mxu1 %v1950_v9  ;;  %1666 = vmatprep.mubr.msk.bf16.mxu0 %vm1951_vm2, %v1950_v9  ;;  %v1581_v21 = vld [vmem:[%s2374_s4] ss:$0 sm:$0xff]  ;;  %s2407_s24 = sld [smem:[#allocation14_spill]]  ;;  %s1611_s26 = sshll.u32 %s1936_s17, 7 }
  0x2b   : > { %v506_v1 = vld [vmem:[%s2117_s12] sm:$0xff]  ;;  %1653 = vmatpush3.bf16.msra.mxu1 %v1829_v10 }
  0x2c   : > { %v510_v2 = vsel %vm509_vm1, %v506_v1, 0.0  ;;  %1658 = vmatprep.subr.bf16.mxu1 %v1950_v9 }
  0x2d   : > { %511 = vadd.xlane.f32.xlu0 %v510_v2 }
  0xb6   : > { %v512_v3 = vpop.xlane.xlu0 %511 }
  0xb7   : > { %v514_v4 = vmul.f32 0.03125, %v512_v3 }
  0xb9   : > { %v515_v5 = vsub.f32 %v506_v1, %v514_v4 }
  0xbb   : > { %v516_v6 = vmul.f32 %v515_v5, %v515_v5 }
  0xbd   : > { %v517_v7 = vsel %vm509_vm1, %v516_v6, 0.0 }
  0xbe   : > { %518 = vadd.xlane.f32.xlu0 %v517_v7 }
 0x147   : > { %v519_v11 = vpop.xlane.xlu0 %518 }
 0x148   : > { %v520_v12 = vmul.f32 0.03125, %v519_v11 }
 0x14a   : > { %v521_v13 = vadd.f32 1e-05, %v520_v12 }
 0x14c   : > { %1836 = vrsqrt.f32 %v521_v13 }
 0x159   : > { %v1837_v14 = vpop.eup %1836 }
 0x15a   : > { %v523_v16 = vmul.f32 %v1837_v14, %v515_v5 }
 0x15c   : > { %v530_v18 = vmul.f32 %v1579_v15, %v523_v16 }
 0x15e   : > { %v537_v19 = vadd.f32 %v1580_v17, %v530_v18 }
 0x160   : > { %v538_v20 = vpack.c.bf16 %v537_v19, %v537_v19 }
 0x162   : > { %1655 = vmatmul.mubr.msk.bf16.vlgmr.msra.gmra.mxu1 %vm509_vm1, %v538_v20 }
 0x163   : > { %1660 = vmatprep.mubr.msk.bf16.mxu1 %vm1951_vm2, %v1950_v9 }
 0x222   : > { %v599_v22 = vpop.f32.mrf.mxu1 }
 0x223   : > { %v600_v23 = vadd.f32 %v1581_v21, %v599_v22 }
 0x224   : > { %v1656_v24 = vpop.f32.mrf.mxu1 }
 0x225   : > { %v2150_v25 = vpack.c.bf16 %v600_v23, %v600_v23 }
 0x226   : > { %v602_v26 = vpop.f32.mrf.mxu1 }
 0x227   : > { %611 = vrot.lane.b32.xlu0 %v2150_v25, %s1952_s27  ;;  %607 = vrot.lane.b32.xlu1 %v2150_v25, %s1953_s28  ;;  %s2408_s28 = sld [smem:[#allocation15_spill]] }
 0x228   : > { %v1657_v27 = vpop.f32.mrf.mxu1 }
 0x22b   : > { %609 = vrot.lane.b32.xlu1 %v2150_v25, %s1954_s29 }
 0x22d   : > { %s2314_s29 = scalar_lea.hbm %s2408_s28, %s1611_s26 }
 0x22f   : > { %613 = vrot.lane.b32.xlu1 %v2150_v25, %s1955_s15 }
 0x299   : > { %v2156_v28 = vpop.permute.xlu1 %607  ;;  %v2162_v30 = vpop.permute.xlu0 %611 }
 0x29a   : > { %662 = vrot.lane.b32.xlu1 %v2156_v28, %s1955_s15 }
 0x29d   : > { %v2159_v29 = vpop.permute.xlu1 %609 }
 0x29e   : > { %710 = vrot.lane.b32.xlu1 %v2159_v29, %s1955_s15 }
 0x2a1   : > { %v614_v31 = vpop.permute.xlu1 %613 }
 0x2a2   : > { %v620_v32 = vsel %vm615_vm3, %v614_v31, 0  ;;  %758 = vrot.lane.b32.xlu1 %v2162_v30, %s1955_s15  ;;  %s1444_s15 = scalar_lea.sflag [#allocation3], %s473_s22 }
 0x2a3   : > { %1659 = vmatpush3.bf16.xpose.msra.mxu1 %v620_v32 }
 0x2a4   : > { %1670 = vmatprep.subr.bf16.mxu1 %v1950_v9 }
 0x2aa   : > { %1661 = vmatmul.mubr.msk.bf16.vlgmr.msra.gmra.mxu1 %vm615_vm3, %v2150_v25 }
 0x2ab   : > { %1672 = vmatprep.mubr.msk.bf16.mxu1 %vm1951_vm2, %v1950_v9 }
 0x30c   : > { %v663_v33 = vpop.permute.xlu1 %662 }
 0x30d   : > { %v668_v34 = vsel %vm615_vm3, %v663_v33, 0 }
 0x30e   : > { %1665 = vmatpush3.bf16.xpose.msra.mxu0 %v668_v34  ;;  %v1056_v34 = vld [vmem:[%s2375_s5] sm:$0xf] }
 0x30f   : > { %1676 = vmatprep.subr.bf16.mxu0 %v1950_v9 }
 0x310   : > { %v711_v35 = vpop.permute.xlu1 %710 }
 0x311   : > { %v716_v36 = vsel %vm615_vm3, %v711_v35, 0 }
 0x312   : > { %1671 = vmatpush3.bf16.xpose.msra.mxu1 %v716_v36 }
 0x313   : > { %1682 = vmatprep.subr.bf16.mxu1 %v1950_v9 }
 0x314   : > { %v759_v37 = vpop.permute.xlu1 %758 }
 0x315   : > { %v764_v38 = vsel %vm615_vm3, %v759_v37, 0  ;;  %1667 = vmatmul.mubr.msk.bf16.vlgmr.msra.gmra.mxu0 %vm615_vm3, %v2156_v28 }
 0x316   : > { %1677 = vmatpush3.bf16.xpose.msra.mxu0 %v764_v38  ;;  %1678 = vmatprep.mubr.msk.bf16.mxu0 %vm1951_vm2, %v1950_v9  ;;  %v1064_v38 = vsel %vm864_vm4, %v1056_v34, 0 }
 0x317   : > { %1688 = vmatprep.subr.bf16.mxu0 %v1950_v9 }
 0x319   : > { %1673 = vmatmul.mubr.msk.bf16.vlgmr.msra.gmra.mxu1 %vm615_vm3, %v2159_v29 }
 0x31a   : > { %1684 = vmatprep.mubr.msk.bf16.mxu1 %vm1951_vm2, %v1950_v9 }
 0x31d   : > { %1679 = vmatmul.mubr.msk.bf16.vlgmr.msra.gmra.mxu0 %vm615_vm3, %v2162_v30 }
 0x31e   : > { %1690 = vmatprep.mubr.msk.bf16.mxu0 %vm1951_vm2, %v1950_v9 }
 0x36a   : > { %v656_v39 = vpop.f32.mrf.mxu1 }
 0x36b   : > { %v806_v40 = vsel %vm615_vm3, %v656_v39, -inf }
 0x36c   : > { %807 = vmax.xlane.f32.xlu1 %v806_v40  ;;  %v1662_v41 = vpop.f32.mrf.mxu1  ;;  %v1057_v40 = vld [vmem:[%s2375_s5 + $0x4] sm:$0xf] }
 0x36e   : > { %v659_v42 = vpop.f32.mrf.mxu1 }
 0x370   : > { %v1663_v43 = vpop.f32.mrf.mxu1 }
 0x371   : > { %v1110_v43 = vsel %vm864_vm4, %v1057_v40, 0 }
 0x3d5   : > { %v704_v44 = vpop.f32.mrf.mxu0 }
 0x3d6   : > { %v809_v45 = vsel %vm615_vm3, %v704_v44, -inf }
 0x3d7   : > { %810 = vmax.xlane.f32.xlu0 %v809_v45  ;;  %v1668_v46 = vpop.f32.mrf.mxu0 }
 0x3d9   : > { %v707_v47 = vpop.f32.mrf.mxu0  ;;  %v752_v48 = vpop.f32.mrf.mxu1 }
 0x3da   : > { %v812_v49 = vsel %vm615_vm3, %v752_v48, -inf }
 0x3db   : > { %v1669_v50 = vpop.f32.mrf.mxu0  ;;  %813 = vmax.xlane.f32.xlu1 %v812_v49  ;;  %v1674_v51 = vpop.f32.mrf.mxu1 }
 0x3dc   : > { %v1059_v51 = vld [vmem:[%s2375_s5 + $0xc] sm:$0xf] }
 0x3dd   : > { %v755_v52 = vpop.f32.mrf.mxu1  ;;  %v800_v53 = vpop.f32.mrf.mxu0 }
 0x3de   : > { %v815_v54 = vsel %vm615_vm3, %v800_v53, -inf }
 0x3df   : > { %816 = vmax.xlane.f32.xlu0 %v815_v54  ;;  %v1675_v55 = vpop.f32.mrf.mxu1  ;;  %v1680_v56 = vpop.f32.mrf.mxu0  ;;  %v1202_v54 = vsel %vm864_vm4, %v1059_v51, 0  ;;  %v1835_v51 = vld [vmem:[%s2381_s11] sm:$0xff]  }
 0x3e1   : > { %v803_v57 = vpop.f32.mrf.mxu0 }
 0x3e3   : > { %v1681_v58 = vpop.f32.mrf.mxu0 }
 0x3ec   : > { %859 = vrot.lane.b32.xlu1 %v2150_v25, %s1956_s16 }
 0x3f5   : > { %v808_v59 = vpop.xlane.xlu1 %807 }
 0x3f6   : > { %v818_v60 = vsub.f32 %v656_v39, %v808_v59 }
 0x3f8   : > { %v822_v61 = vmul.f32 1.442695, %v818_v60 }
 0x3fa   : > { %1838 = vpow2.f32 %v822_v61 }
 0x407   : > { %v1839_v62 = vpop.eup %1838 }
 0x408   : > { %v830_v63 = vsel %vm615_vm3, %v1839_v62, 0.0 }
 0x410   : > { %831 = vadd.xlane.f32.xlu1 %v830_v63 }
 0x460   : > { %v811_v0 = vpop.xlane.xlu0 %810 }
 0x461   : > { %v819_v1 = vsub.f32 %v704_v44, %v811_v0  ;;  %v1058_v44 = vld [vmem:[%s2375_s5 + $0x8] sm:$0xf] }
 0x462   : > { %v1156_v47 = vsel %vm864_vm4, %v1058_v44, 0  ;;  %v1598_v44 = vld [vmem:[%s2377_s7] ss:$0 sm:$0xff] }
 0x463   : > { %v824_v2 = vmul.f32 1.442695, %v819_v1 }
 0x464   : > { %v814_v3 = vpop.xlane.xlu1 %813 }
 0x465   : > { %1840 = vpow2.f32 %v824_v2  ;;  %v820_v4 = vsub.f32 %v752_v48, %v814_v3 }
 0x467   : > { %v826_v5 = vmul.f32 1.442695, %v820_v4 }
 0x468   : > { %v817_v6 = vpop.xlane.xlu0 %816  ;;  %v860_v7 = vpop.permute.xlu1 %859 }
 0x469   : > { %1842 = vpow2.f32 %v826_v5  ;;  %v821_v8 = vsub.f32 %v800_v53, %v817_v6  ;;  %v866_v10 = vsel %vm864_vm4, %v860_v7, 0 }
 0x46a   : > { %1683 = vmatpush3.bf16.msra.mxu1 %v866_v10 }
 0x46b   : > { %v828_v11 = vmul.f32 1.442695, %v821_v8  ;;  %1694 = vmatprep.subr.bf16.mxu1 %v1950_v9 }
 0x46d   : > { %1844 = vpow2.f32 %v828_v11 }
 0x472   : > { %v1841_v12 = vpop.eup %1840 }
 0x473   : > { %v833_v13 = vsel %vm615_vm3, %v1841_v12, 0.0 }
 0x474   : > { %834 = vadd.xlane.f32.xlu0 %v833_v13 }
 0x476   : > { %v1843_v14 = vpop.eup %1842 }
 0x477   : > { %v836_v15 = vsel %vm615_vm3, %v1843_v14, 0.0 }
 0x478   : > { %837 = vadd.xlane.f32.xlu1 %v836_v15 }
 0x47a   : > { %v1845_v16 = vpop.eup %1844 }
 0x47b   : > { %v839_v17 = vsel %vm615_vm3, %v1845_v16, 0.0 }
 0x47c   : > { %840 = vadd.xlane.f32.xlu0 %v839_v17 }
 0x489   : > { %956 = vrot.lane.b32.xlu1 %v2159_v29, %s1956_s16 }
 0x48d   : > { %1004 = vrot.lane.b32.xlu1 %v2162_v30, %s1956_s16 }
 0x492   : > { %908 = vrot.lane.b32.xlu0 %v2156_v28, %s1956_s16  ;;  %s1957_s16 = smov [#allocation2]  }
 0x493   : > { %s1860_s18 = sshll.u32 %s1957_s16, 4  ;;  %s1861_s18 = int_to_ptr.vmem [resolvable:$false] %s1860_s18 }
 0x494   : > { %s1862_s19 = scalar_lea.vmem %s1861_s18, 256 }
 0x499   : > { %v832_v18 = vpop.xlane.xlu1 %831 }
 0x49a   : > { %1846 = vrcp.f32 %v832_v18 }
 0x4a7   : > { %v1847_v19 = vpop.eup %1846 }
 0x4a8   : > { %v846_v20 = vmul.f32 %v1847_v19, %v1839_v62 }
 0x4aa   : > { %v850_v21 = vpack.c.bf16 %v846_v20, %v846_v20 }
 0x4ac   : > { %855 = vst.msk [vmem:[%s2115_s13] sm:$0xf] %vm854_vm5, %v850_v21  ;;  %1685 = vmatmul.mubr.msk.bf16.vlgmr.msra.gmra.mxu1 %vm615_vm3, %v850_v21 }
 0x4ad   : > { %1696 = vmatprep.mubr.msk.bf16.mxu1 %vm1951_vm2, %v1950_v9 }
 0x4fd   : > { %v835_v22 = vpop.xlane.xlu0 %834 }
 0x4fe   : > { %1848 = vrcp.f32 %v835_v22 }
 0x501   : > { %v838_v23 = vpop.xlane.xlu1 %837 }
 0x502   : > { %1850 = vrcp.f32 %v838_v23  ;;  %v1597_v23 = vld [vmem:[%s2376_s6] ss:$0 sm:$0xff] }
 0x505   : > { %v841_v24 = vpop.xlane.xlu0 %840  ;;  %v957_v25 = vpop.permute.xlu1 %956 }
 0x506   : > { %1852 = vrcp.f32 %v841_v24  ;;  %v962_v26 = vsel %vm864_vm4, %v957_v25, 0 }
 0x507   : > { %1695 = vmatpush3.bf16.msra.mxu1 %v962_v26 }
 0x508   : > { %1706 = vmatprep.subr.bf16.mxu1 %v1950_v9 }
 0x509   : > { %v909_v27 = vpop.permute.xlu0 %908  ;;  %v1005_v31 = vpop.permute.xlu1 %1004 }
 0x50a   : > { %v914_v28 = vsel %vm864_vm4, %v909_v27, 0  ;;  %v1010_v35 = vsel %vm864_vm4, %v1005_v31, 0 }
 0x50b   : > { %v1849_v29 = vpop.eup %1848  ;;  %1689 = vmatpush3.bf16.msra.mxu0 %v914_v28 }
 0x50c   : > { %1700 = vmatprep.subr.bf16.mxu0 %v1950_v9  ;;  %v847_v30 = vmul.f32 %v1849_v29, %v1841_v12 }
 0x50e   : > { %v851_v32 = vpack.c.bf16 %v847_v30, %v847_v30 }
 0x50f   : > { %v1851_v33 = vpop.eup %1850 }
 0x510   : > { %856 = vst.msk [vmem:[%s2115_s13 + $0x4] sm:$0xf] %vm854_vm5, %v851_v32  ;;  %1691 = vmatmul.mubr.msk.bf16.vlgmr.msra.gmra.mxu0 %vm615_vm3, %v851_v32  ;;  %v848_v36 = vmul.f32 %v1851_v33, %v1843_v14 }
 0x511   : > { %1701 = vmatpush3.bf16.msra.mxu0 %v1010_v35  ;;  %1702 = vmatprep.mubr.msk.bf16.mxu0 %vm1951_vm2, %v1950_v9 }
 0x512   : > { %v852_v37 = vpack.c.bf16 %v848_v36, %v848_v36  ;;  %1712 = vmatprep.subr.bf16.mxu0 %v1950_v9  ;;  %v1830_v36 = vld [vmem:[%s2379_s9 + $0x8] sm:$0xff]  }
 0x513   : > { %v1853_v39 = vpop.eup %1852 }
 0x514   : > { %857 = vst.msk [vmem:[%s2115_s13 + $0x8] sm:$0xf] %vm854_vm5, %v852_v37  ;;  %1697 = vmatmul.mubr.msk.bf16.vlgmr.msra.gmra.mxu1 %vm615_vm3, %v852_v37  ;;  %v849_v41 = vmul.f32 %v1853_v39, %v1845_v16  ;;  %v1831_v37 = vld [vmem:[%s2379_s9] sm:$0xff]   ;;  %v1833_v39 = vld [vmem:[%s2381_s11 + $0x10] sm:$0xff]  }
 0x515   : > { %1707 = vmatpush3.bf16.msra.mxu1 %v1064_v38  ;;  %1708 = vmatprep.mubr.msk.bf16.mxu1 %vm1951_vm2, %v1950_v9  ;;  %v1832_v38 = vld [vmem:[%s2381_s11 + $0x18] sm:$0xff]  }
 0x516   : > { %v853_v42 = vpack.c.bf16 %v849_v41, %v849_v41  ;;  %1718 = vmatprep.subr.bf16.mxu1 %v1950_v9 }
 0x518   : > { %858 = vst.msk [vmem:[%s2115_s13 + $0xc] sm:$0xf] %vm854_vm5, %v853_v42  ;;  %1703 = vmatmul.mubr.msk.bf16.vlgmr.msra.gmra.mxu0 %vm615_vm3, %v853_v42  ;;  %s1464_s13 = sshll.u32 %s2117_s12, 4  ;;  %s2316_s13 = int_to_ptr.vmem [resolvable:$true] %s1464_s13 }
 0x519   : > { %1713 = vmatpush3.bf16.msra.mxu0 %v1110_v43  ;;  %1714 = vmatprep.mubr.msk.bf16.mxu0 %vm1951_vm2, %v1950_v9  ;;  %s1856_s17 = scalar_lea.vmem %s2316_s13, 128  ;;  %p1863_p5 = scmp.lt.s32.totalorder %s2316_s13, %s1861_s18 }
 0x51a   : > { %1724 = vmatprep.subr.bf16.mxu0 %v1950_v9  ;;  %p1857_p1 = scmp.ne.s32.totalorder %s2316_s13, %s1856_s17  ;;  %p1864_p6 = scmp.lt.s32.totalorder %s1862_s19, %s1856_s17 }
 0x51c   : > { %p1858_p2 = pnand %p1857_p1, %p2082_p3  ;;  %p1865_p7 = por %p1864_p6, %p1863_p5 }
 0x51e   : > { %p1859_p4 = pneg %p1858_p2 }
 0x520   : > { %p1866_p8 = pnand %p1865_p7, %p1859_p4 }
 0x56c   : > { %v902_v45 = vpop.f32.mrf.mxu1 }
 0x56d   : > { %v1052_v46 = vpack.c.bf16 %v902_v45, %v902_v45 }
 0x56e   : > { %v1686_v48 = vpop.f32.mrf.mxu1 }
 0x56f   : > { %1709 = vmatmul.mubr.msk.bf16.vlgmr.msra.gmra.mxu1 %vm615_vm3, %v1052_v46  ;;  %v1599_v46 = vld [vmem:[%s2378_s8] ss:$0 sm:$0xff] }
 0x570   : > { %v905_v49 = vpop.f32.mrf.mxu1  ;;  %1719 = vmatpush3.bf16.msra.mxu1 %v1156_v47  ;;  %1720 = vmatprep.mubr.msk.bf16.mxu1 %vm1951_vm2, %v1950_v9 }
 0x571   : > { %1730 = vmatprep.subr.bf16.mxu1 %v1950_v9 }
 0x572   : > { %v1687_v50 = vpop.f32.mrf.mxu1 }
 0x573   : > { %v1834_v50 = vld [vmem:[%s2381_s11 + $0x8] sm:$0xff]  }
 0x5d0   : > { %v950_v52 = vpop.f32.mrf.mxu0 }
 0x5d1   : > { %v1053_v53 = vpack.c.bf16 %v950_v52, %v950_v52  ;;  %v1600_v52 = vld [vmem:[%s2380_s10] ss:$0 sm:$0xff] }
 0x5d2   : > { %v1692_v55 = vpop.f32.mrf.mxu0 }
 0x5d3   : > { %1715 = vmatmul.mubr.msk.bf16.vlgmr.msra.gmra.mxu0 %vm615_vm3, %v1053_v53 }
 0x5d4   : > { %v953_v56 = vpop.f32.mrf.mxu0  ;;  %v998_v57 = vpop.f32.mrf.mxu1  ;;  %1725 = vmatpush3.bf16.msra.mxu0 %v1202_v54  ;;  %1726 = vmatprep.mubr.msk.bf16.mxu0 %vm1951_vm2, %v1950_v9 }
 0x5d5   : > { %v1054_v58 = vpack.c.bf16 %v998_v57, %v998_v57  ;;  %1738 = vmatprep.subr.bf16.mxu0 %v1950_v9 }
 0x5d6   : > { %v1693_v59 = vpop.f32.mrf.mxu0  ;;  %v1698_v60 = vpop.f32.mrf.mxu1 }
 0x5d7   : > { %1721 = vmatmul.mubr.msk.bf16.vlgmr.msra.gmra.mxu1 %vm615_vm3, %v1054_v58  ;;  %v1604_v60 = vld [vmem:[%s2407_s24] ss:$0 sm:$0xff] }
 0x5d8   : > { %v1001_v61 = vpop.f32.mrf.mxu1  ;;  %v1046_v62 = vpop.f32.mrf.mxu0  ;;  %1734 = vmatprep.mubr.msk.bf16.mxu1 %vm1951_vm2, %v1950_v9  ;;  %1731 = vmatpush3.bf16.msra.mxu1 %v1830_v36 }
 0x5d9   : > { %v1055_v63 = vpack.c.bf16 %v1046_v62, %v1046_v62  ;;  %1732 = vmatprep.subr.bf16.mxu1 %v1950_v9 }
 0x5da   : > { %v1699_v0 = vpop.f32.mrf.mxu1  ;;  %v1704_v1 = vpop.f32.mrf.mxu0 }
 0x5db   : > { %1727 = vmatmul.mubr.msk.bf16.vlgmr.msra.gmra.mxu0 %vm615_vm3, %v1055_v63 }
 0x5dc   : > { %v1049_v2 = vpop.f32.mrf.mxu0  ;;  %1746 = vmatprep.mubr.msk.bf16.mxu0 %vm1951_vm2, %v1950_v9  ;;  %1733 = vmatpush3.bf16.msra.mxu1 %v1831_v37 }
 0x5dd   : > { %1739 = vmatpush3.bf16.msra.mxu0 %v1832_v38 }
 0x5de   : > { %v1705_v3 = vpop.f32.mrf.mxu0  ;;  %1740 = vmatprep.subr.bf16.mxu0 %v1950_v9 }
 0x5e1   : > { %1741 = vmatpush3.bf16.msra.mxu0 %v1833_v39 }
 0x5e2   : > { %1742 = vmatprep.subr.bf16.mxu0 %v1950_v9 }
 0x5e5   : > { %1743 = vmatpush3.bf16.msra.mxu0 %v1834_v50 }
 0x5e6   : > { %1744 = vmatprep.subr.bf16.mxu0 %v1950_v9 }
 0x5e9   : > { %1745 = vmatpush3.bf16.msra.mxu0 %v1835_v51 }
 0x62f   : > { %v1100_v4 = vpop.f32.mrf.mxu1 }
 0x630   : > { %v1244_v14 = vsel %vm509_vm1, %v1100_v4, 0.0 }
 0x631   : > { %v1710_v5 = vpop.f32.mrf.mxu1 }
 0x633   : > { %v1103_v6 = vpop.f32.mrf.mxu1 }
 0x635   : > { %v1711_v7 = vpop.f32.mrf.mxu1 }
 0x693   : > { %v1146_v8 = vpop.f32.mrf.mxu0 }
 0x694   : > { %v1245_v11 = vsel %vm509_vm1, %v1146_v8, 0.0 }
 0x695   : > { %v1716_v10 = vpop.f32.mrf.mxu0  ;;  %v1246_v16 = vadd.f32 %v1245_v11, %v1244_v14 }
 0x697   : > { %v1149_v12 = vpop.f32.mrf.mxu0  ;;  %v1192_v13 = vpop.f32.mrf.mxu1 }
 0x698   : > { %v1247_v15 = vsel %vm509_vm1, %v1192_v13, 0.0 }
 0x699   : > { %v1717_v17 = vpop.f32.mrf.mxu0  ;;  %v1722_v18 = vpop.f32.mrf.mxu1  ;;  %v1248_v19 = vadd.f32 %v1247_v15, %v1246_v16 }
 0x69b   : > { %v1195_v20 = vpop.f32.mrf.mxu1  ;;  %v1238_v21 = vpop.f32.mrf.mxu0 }
 0x69c   : > { %v1249_v22 = vsel %vm509_vm1, %v1238_v21, 0.0 }
 0x69d   : > { %v1250_v24 = vadd.f32 %v1249_v22, %v1248_v19  ;;  %v1723_v25 = vpop.f32.mrf.mxu1  ;;  %v1728_v26 = vpop.f32.mrf.mxu0 }
 0x69f   : > { %v1241_v27 = vpop.f32.mrf.mxu0  ;;  %v1258_v28 = vadd.f32 %v1597_v23, %v1250_v24 }
 0x6a1   : > { %v1729_v29 = vpop.f32.mrf.mxu0  ;;  %v1261_v30 = vsel %vm509_vm1, %v1258_v28, 0.0 }
 0x6a2   : > { %1262 = vadd.xlane.f32.xlu0 %v1261_v30 }
 0x72b   : > { %v1263_v31 = vpop.xlane.xlu0 %1262 }
 0x72c   : > { %v1264_v32 = vmul.f32 0.03125, %v1263_v31 }
 0x72e   : > { %v1265_v33 = vsub.f32 %v1258_v28, %v1264_v32 }
 0x730   : > { %v1266_v34 = vmul.f32 %v1265_v33, %v1265_v33 }
 0x732   : > { %v1267_v35 = vsel %vm509_vm1, %v1266_v34, 0.0 }
 0x733   : > { %1268 = vadd.xlane.f32.xlu1 %v1267_v35 }
 0x7bc   : > { %v1269_v40 = vpop.xlane.xlu1 %1268 }
 0x7bd   : > { %v1270_v41 = vmul.f32 0.03125, %v1269_v40 }
 0x7bf   : > { %v1271_v42 = vadd.f32 1e-05, %v1270_v41 }
 0x7c1   : > { %1854 = vrsqrt.f32 %v1271_v42 }
 0x7ce   : > { %v1855_v43 = vpop.eup %1854 }
 0x7cf   : > { %v1273_v45 = vmul.f32 %v1855_v43, %v1265_v33 }
 0x7d1   : > { %v1280_v47 = vmul.f32 %v1598_v44, %v1273_v45 }
 0x7d3   : > { %v1287_v48 = vadd.f32 %v1599_v46, %v1280_v47 }
 0x7d5   : > { %v1288_v49 = vpack.c.bf16 %v1287_v48, %v1287_v48 }
 0x7d7   : > { %1735 = vmatmul.mubr.msk.bf16.vlgmr.msra.gmra.mxu1 %vm509_vm1, %v1288_v49 }
 0x897   : > { %v1349_v53 = vpop.f32.mrf.mxu1 }
 0x898   : > { %v1350_v54 = vadd.f32 %v1600_v52, %v1349_v53 }
 0x899   : > { %v1736_v55 = vpop.f32.mrf.mxu1 }
 0x89a   : > { %vm1355_vm6 = vcmp.gt.f32.partialorder %v1350_v54, 0.0  ;;  %v1356_v56 = vmul.f32 0.01, %v1350_v54 }
 0x89b   : > { %v1352_v57 = vpop.f32.mrf.mxu1 }
 0x89c   : > { %v1357_v9 = vsel %vm1355_vm6, %v1350_v54, %v1356_v56 }
 0x89d   : > { %v1358_v58 = vpack.c.bf16 %v1357_v9, %v1357_v9  ;;  %v1737_v59 = vpop.f32.mrf.mxu1 }
 0x89f   : > { %1747 = vmatmul.mubr.msk.bf16.vlgmr.msra.gmra.mxu0 %vm1398_vm7, %v1358_v58 }
 0x95f   : > { %v1436_v61 = vpop.f32.mrf.mxu0 }
 0x960   : > { %v1437_v62 = vadd.f32 %v1604_v60, %v1436_v61 }
 0x961   : > { %v1748_v63 = vpop.f32.mrf.mxu0 }
 0x962   : > { %1442 = vst.msk [vmem:[%s2117_s12] sm:$0xff] %vm509_vm1, %v1437_v62 }
 0x963   : > { %v1439_v0 = vpop.f32.mrf.mxu0 }
 0x964   : > { %1869 = shalt.err (!%p1866_p8)
}
 0x965   : > { %s1870_s12 = scalar_lea.hbm %s2314_s29, 128  ;;  %s1874_s23 = scalar_lea.hbm %s2408_s28, 256 }
 0x966   : > { %p1871_p10 = scmp.ne.s32.totalorder %s2314_s29, %s1870_s12  ;;  %p1875_p13 = scmp.lt.s32.totalorder %s2314_s29, %s2408_s28 }
 0x967   : > { %p1876_p0 = scmp.lt.s32.totalorder %s1874_s23, %s1870_s12 }
 0x968   : > { %p1872_p11 = pnand %p1871_p10, %p2082_p3 }
 0x969   : > { %p1877_p1 = por %p1876_p0, %p1875_p13 }
 0x96a   : > { %p1873_p12 = pneg %p1872_p11 }
 0x96c   : > { %p1878_p2 = pnand %p1877_p1, %p1873_p12 }
 0x96e   : > { %1881 = shalt.err (!%p1878_p2)
}
 0x96f   : > { %1750 = dma.vmem_to_hbm [thread:$0]  (%p2082_p3), %s2316_s13, 128, %s2314_s29, %s1444_s15   ;;  %v1749_v1 = vpop.f32.mrf.mxu0 }
 0x970 PF: > { %s2409_s21 = sld [smem:[#allocation9_spill]] }
 0x971   : > { %s2410_s27 = sld [smem:[#allocation5_spill]] }
 0x976   : > { %p1756_p4 = scmp.ge.s32.totalorder %s2409_s21, 2 }
 0x977   : > { %s1481_s16 = sand.u32 1, %s2410_s27  }
 0x978   : > { %p1753_p5 = pnand %p1756_p4, %p2092_p9  ;;  %s1482_s18 = scalar_lea.sflag [#allocation3], %s1481_s16 }
 0x97a   : > { %p1754_p6 = pneg %p1753_p5 }
 0x97c   : > { %1915 = dma.done.wait (%p1754_p6), %s1482_s18, 128  }
 0x97d   : > { %1917 = vsyncadd (%p1754_p6), %s1482_s18, 4294967168  ;;  %s28_s20 = sadd.s32 1, %s2409_s21   ;;  %s2412_s25 = sld [smem:[#allocation6_spill]] }
 0x97e   : > { %p25_p7 = scmp.ge.s32.totalorder %s28_s20, 6   ;;  %s2413_s15 = sld [smem:[#allocation13_spill]] }
 0x97f   : > { %s2414_s16 = sld [smem:[#allocation7_spill]]  ;;  %s2418_s29 = smov %s1924_s30 }
 0x980   : > { %s2415_s17 = sld [smem:[#allocation8_spill]]  ;;  %27 = sbr.rel (!%p25_p7) target bundleno = 8 (0x8), region = 123 }
 0x981   : > { %s2416_s18 = sld [smem:[#allocation10_spill]] }
 0x982   : > { %s2417_s19 = sld [smem:[#allocation11_spill]] }
 0x983   : > { %s2419_s30 = smov %s2412_s25 }
 0x985   :  { %1497 = vsyncpa [#allocation3], 1 }
 0x986   :  { %1499 = vsyncpa [#allocation3 + $0x1], 1 }

</bundles_post_ra>
